<compile_context>
chip_gen: v5e
topology: v5e:2x2
jax: 0.10.0
libtpu: 0.0.40
codegen_flags: <defaults>
</compile_context>

<pallas_src>
import jax
import jax.numpy as jnp
from jax.experimental import pallas as pl
from jax.experimental.pallas import tpu as pltpu


def _erf(x):
    # Abramowitz & Stegun 7.1.26 polynomial erf (|err| < 1.5e-7, f32).
    a1, a2, a3, a4, a5 = 0.254829592, -0.284496736, 1.421413741, -1.453152027, 1.061405429
    p = 0.3275911
    ax = jnp.abs(x)
    t = 1.0 / (1.0 + p * ax)
    poly = ((((a5 * t + a4) * t + a3) * t + a2) * t + a1) * t
    y = 1.0 - poly * jnp.exp(-ax * ax)
    return jnp.where(x < 0.0, -y, y)


def _gelu_exact(x):
    # matches nn.GELU() (erf-based, approximate='none'); kept in f32.
    return 0.5 * x * (1.0 + _erf(x * 0.7071067811865476))


def _block_forward(taps, x0, wdw_blk, w2_blk, b2, w3_blk, bout, shortcut):
    # depthwise 3x3x3 conv as ONE block-diagonal MXU matmul over pre-shifted,
    # pre-masked taps: (NBC, 27*NBC) @ (27*NBC, S).
    acc = jnp.dot(wdw_blk, taps, preferred_element_type=jnp.float32)   # (NBC, S)

    # InstanceNorm3d (no affine): per-(n,c)-row mean/var over the lane axis.
    # (b_dw is dropped on purpose: the mean subtraction cancels it exactly.)
    mean = jnp.mean(acc, axis=1, keepdims=True)
    cent = acc - mean                                                   # computed once, reused
    var = jnp.mean(cent * cent, axis=1, keepdims=True)
    xn = cent * jax.lax.rsqrt(var + 1e-5)                               # (NBC, S)

    # 1x1x1 conv (C -> exp_r*C) + exact GELU
    h = jnp.dot(w2_blk, xn, preferred_element_type=jnp.float32) + b2    # (NB*hid, S)
    h = _gelu_exact(h)

    # 1x1x1 conv (exp_r*C -> Co) + residual (shortcut matmul or identity add)
    y = jnp.dot(w3_blk, h, preferred_element_type=jnp.float32) + bout   # (NB*Co, S)
    return y + shortcut(x0)


def _kernel_proj(taps_ref, x0_ref, wdw_ref, w2_ref, b2_ref, w3_ref, wsc_ref,
                 bout_ref, o_ref):
    y = _block_forward(
        taps_ref[0], x0_ref[0], wdw_ref[...], w2_ref[...], b2_ref[...],
        w3_ref[...], bout_ref[...],
        shortcut=lambda x0: jnp.dot(wsc_ref[...], x0,
                                    preferred_element_type=jnp.float32))
    o_ref[0] = y


def _kernel_ident(taps_ref, x0_ref, wdw_ref, w2_ref, b2_ref, w3_ref,
                  bout_ref, o_ref):
    y = _block_forward(
        taps_ref[0], x0_ref[0], wdw_ref[...], w2_ref[...], b2_ref[...],
        w3_ref[...], bout_ref[...],
        shortcut=lambda x0: x0)
    o_ref[0] = y


def _choose_nb(N, C, sublanes=8):
    """Largest sample fold NB with NB*C <= 8 sublanes, N % NB == 0, and
    (when N >= 2) at least 2 parallel grid steps kept for v7x's two TCs."""
    best = 1
    for nb in range(1, N + 1):
        if N % nb:
            continue
        if nb * C > sublanes:
            continue
        if N // nb < 2 <= N:
            continue
        best = nb
    return best


def convnext_block(x_ncdhw, params, in_channels, out_channels, exp_r):
    N, C, D, H, W = x_ncdhw.shape
    assert C == in_channels
    Co = out_channels
    hid = exp_r * in_channels
    S = D * H * W
    f32 = jnp.float32

    NB = _choose_nb(N, C)
    G = N // NB
    NBC, NBH, NBCo = NB * C, NB * hid, NB * Co
    K27 = 27 * NBC

    # ---- wrapper-side input prep: lane-dense, pre-shifted, pre-masked taps ---
    xflat = x_ncdhw.reshape(N, C, S).astype(f32)
    x0 = xflat.reshape(G, NBC, S)                           # unshifted input (row = nb*C + c)
    xp5 = jnp.pad(x_ncdhw.astype(f32), ((0, 0), (0, 0), (1, 1), (1, 1), (1, 1)))
    tap_list = [xp5[:, :, kd:kd + D, kh:kh + H, kw:kw + W].reshape(N, C, S)
                for kd in range(3) for kh in range(3) for kw in range(3)]
    taps = jnp.stack(tap_list, axis=0)                      # (27, N, C, S)
    taps = taps.reshape(27, G, NBC, S).transpose(1, 0, 2, 3).reshape(G, K27, S)

    # ---- weight prep: NB-sample block-diagonal slabs -------------------------
    eye_nb = jnp.eye(NB, dtype=f32)
    wdw = params["w_dw"].reshape(C, 27).astype(f32)         # column = kd*9 + kh*3 + kw
    wdw_fold = jnp.tile(wdw, (NB, 1))                       # (NBC, 27)
    wdw_blk = jnp.einsum("rk,rq->rkq", wdw_fold,
                         jnp.eye(NBC, dtype=f32)).reshape(NBC, K27)
    w2_blk = jnp.kron(eye_nb, params["w2"].reshape(hid, C).astype(f32))
    b2_blk = jnp.tile(params["b2"].reshape(hid, 1).astype(f32), (NB, 1))
    w3_blk = jnp.kron(eye_nb, params["w3"].reshape(Co, hid).astype(f32))
    bout = params["b3"].reshape(Co, 1).astype(f32)

    has_proj = in_channels != out_channels
    if has_proj:
        wsc_blk = jnp.kron(eye_nb, params["w_sc"].reshape(Co, C).astype(f32))
        bout = bout + params["b_sc"].reshape(Co, 1).astype(f32)
    bout_blk = jnp.tile(bout, (NB, 1))

    full = lambda g: (0, 0)
    per_g = lambda shape: pl.BlockSpec(shape, lambda g: (g, 0, 0))

    in_specs = [
        per_g((1, K27, S)),                  # taps
        per_g((1, NBC, S)),                  # x0
        pl.BlockSpec((NBC, K27), full),      # block-diag depthwise weights
        pl.BlockSpec((NBH, NBC), full),      # block-diag conv2
        pl.BlockSpec((NBH, 1), full),        # b2
        pl.BlockSpec((NBCo, NBH), full),     # block-diag conv3
    ]
    args = [taps, x0, wdw_blk, w2_blk, b2_blk, w3_blk]
    if has_proj:
        in_specs.append(pl.BlockSpec((NBCo, NBC), full))   # block-diag shortcut
        args.append(wsc_blk)
        kernel = _kernel_proj
    else:
        kernel = _kernel_ident
    in_specs.append(pl.BlockSpec((NBCo, 1), full))         # fused output bias
    args.append(bout_blk)

    out = pl.pallas_call(
        kernel,
        out_shape=jax.ShapeDtypeStruct((G, NBCo, S), f32),
        grid=(G,),
        in_specs=in_specs,
        out_specs=per_g((1, NBCo, S)),
        compiler_params=pltpu.CompilerParams(dimension_semantics=("parallel",)),
    )(*args)
    # (G, NB*Co, S) -> (N, Co, D, H, W): adjacent leading dims, free reshape.
    return out.reshape(N, Co, D, H, W)


def reference(x, p, cin, cout, exp_r):
    """Pure-JAX reference mirroring the PyTorch forward (NCDHW)."""
    hp = jax.lax.Precision.HIGHEST
    dn = jax.lax.conv_dimension_numbers(x.shape, p["w_dw"].shape,
                                        ("NCDHW", "OIDHW", "NCDHW"))
    hid = exp_r * cin
    y = jax.lax.conv_general_dilated(
        x, p["w_dw"], (1, 1, 1), ((1, 1), (1, 1), (1, 1)),
        dimension_numbers=dn, feature_group_count=cin, precision=hp)
    y = y + p["b_dw"].reshape(1, cin, 1, 1, 1)
    mean = jnp.mean(y, axis=(2, 3, 4), keepdims=True)
    var = jnp.mean(jnp.square(y - mean), axis=(2, 3, 4), keepdims=True)
    y = (y - mean) / jnp.sqrt(var + 1e-5)
    y = jnp.einsum('ncdhw,oc->nodhw', y, p["w2"].reshape(hid, cin),
                   precision=hp) + p["b2"].reshape(1, hid, 1, 1, 1)
    y = jax.nn.gelu(y, approximate=False)
    y = jnp.einsum('ncdhw,oc->nodhw', y, p["w3"].reshape(cout, hid),
                   precision=hp) + p["b3"].reshape(1, cout, 1, 1, 1)
    if cin != cout:
        x = jnp.einsum('ncdhw,oc->nodhw', x, p["w_sc"].reshape(cout, cin),
                       precision=hp) + p["b_sc"].reshape(1, cout, 1, 1, 1)
    return x + y


if __name__ == "__main__":
    key = jax.random.PRNGKey(0)

    def u(k, shape, fan_in):
        b = 1.0 / (fan_in ** 0.5)
        return jax.random.uniform(k, shape, jnp.float32, -b, b)

    def make_params(k, cin, cout, exp_r):
        hid = exp_r * cin
        ks = jax.random.split(k, 8)
        return {
            "w_dw": u(ks[0], (cin, 1, 3, 3, 3), 27),   # depthwise conv1
            "b_dw": u(ks[1], (cin,), 27),
            "w2":   u(ks[2], (hid, cin, 1, 1, 1), cin),
            "b2":   u(ks[3], (hid,), cin),
            "w3":   u(ks[4], (cout, hid, 1, 1, 1), hid),
            "b3":   u(ks[5], (cout,), hid),
            "w_sc": u(ks[6], (cout, cin, 1, 1, 1), cin),
            "b_sc": u(ks[7], (cout,), cin),
        }

    N, D, H, W, exp_r = 4, 8, 8, 8, 4
    # Test both branches: projection shortcut (cin != cout) and identity residual.
    for (cin, cout) in [(4, 8), (4, 4)]:
        k1, k2, key = jax.random.split(key, 3)
        params = make_params(k1, cin, cout, exp_r)
        x = jax.random.normal(k2, (N, cin, D, H, W), jnp.float32)

        y = jax.block_until_ready(convnext_block(x, params, cin, cout, exp_r))
        y_ref = reference(x, params, cin, cout, exp_r)
        err = float(jnp.max(jnp.abs(y - y_ref)))
        assert y.shape == (N, cout, D, H, W)
        assert err < 1e-3, f"cin={cin} cout={cout} max abs err {err}"

    print("KERNEL_OK")
</pallas_src>

<mosaic_0001>
module attributes {stable_mosaic.version = 11 : i64} {
  func.func @_kernel_proj(%arg0: i32, %arg1: memref<1x216x512xf32, #tpu.memory_space<vmem>>, %arg2: memref<1x8x512xf32, #tpu.memory_space<vmem>>, %arg3: memref<8x216xf32, #tpu.memory_space<vmem>>, %arg4: memref<32x8xf32, #tpu.memory_space<vmem>>, %arg5: memref<32x1xf32, #tpu.memory_space<vmem>>, %arg6: memref<16x32xf32, #tpu.memory_space<vmem>>, %arg7: memref<16x8xf32, #tpu.memory_space<vmem>>, %arg8: memref<16x1xf32, #tpu.memory_space<vmem>>, %arg9: memref<1x16x512xf32, #tpu.memory_space<vmem>>) attributes {dimension_semantics = [#tpu.dimension_semantics<parallel>], iteration_bounds = array<i64: 2>, scalar_prefetch = 0 : i64, scratch_operands = 0 : i64, tpu.core_type = #tpu.core_type<tc>, window_params = [{transform_indices = @transform_0, window_bounds = array<i64: 1, 216, 512>}, {transform_indices = @transform_1, window_bounds = array<i64: 1, 8, 512>}, {pipeline_mode = #tpu.pipeline_mode<synchronous>, transform_indices = @transform_2, window_bounds = array<i64: 8, 216>}, {pipeline_mode = #tpu.pipeline_mode<synchronous>, transform_indices = @transform_3, window_bounds = array<i64: 32, 8>}, {pipeline_mode = #tpu.pipeline_mode<synchronous>, transform_indices = @transform_4, window_bounds = array<i64: 32, 1>}, {pipeline_mode = #tpu.pipeline_mode<synchronous>, transform_indices = @transform_5, window_bounds = array<i64: 16, 32>}, {pipeline_mode = #tpu.pipeline_mode<synchronous>, transform_indices = @transform_6, window_bounds = array<i64: 16, 8>}, {pipeline_mode = #tpu.pipeline_mode<synchronous>, transform_indices = @transform_7, window_bounds = array<i64: 16, 1>}, {transform_indices = @transform_8, window_bounds = array<i64: 1, 16, 512>}]} {
    %c0 = arith.constant 0 : index
    %c0_0 = arith.constant 0 : index
    %c0_1 = arith.constant 0 : index
    %0 = vector.load %arg1[%c0, %c0_0, %c0_1] : memref<1x216x512xf32, #tpu.memory_space<vmem>>, vector<1x216x512xf32>
    %1 = vector.shape_cast %0 : vector<1x216x512xf32> to vector<216x512xf32>
    %c0_2 = arith.constant 0 : index
    %c0_3 = arith.constant 0 : index
    %c0_4 = arith.constant 0 : index
    %2 = vector.load %arg2[%c0_2, %c0_3, %c0_4] : memref<1x8x512xf32, #tpu.memory_space<vmem>>, vector<1x8x512xf32>
    %3 = vector.shape_cast %2 : vector<1x8x512xf32> to vector<8x512xf32>
    %c0_5 = arith.constant 0 : index
    %c0_6 = arith.constant 0 : index
    %4 = vector.load %arg3[%c0_5, %c0_6] : memref<8x216xf32, #tpu.memory_space<vmem>>, vector<8x216xf32>
    %c0_7 = arith.constant 0 : index
    %c0_8 = arith.constant 0 : index
    %5 = vector.load %arg4[%c0_7, %c0_8] : memref<32x8xf32, #tpu.memory_space<vmem>>, vector<32x8xf32>
    %c0_9 = arith.constant 0 : index
    %c0_10 = arith.constant 0 : index
    %6 = vector.load %arg5[%c0_9, %c0_10] : memref<32x1xf32, #tpu.memory_space<vmem>>, vector<32x1xf32>
    %c0_11 = arith.constant 0 : index
    %c0_12 = arith.constant 0 : index
    %7 = vector.load %arg6[%c0_11, %c0_12] : memref<16x32xf32, #tpu.memory_space<vmem>>, vector<16x32xf32>
    %c0_13 = arith.constant 0 : index
    %c0_14 = arith.constant 0 : index
    %8 = vector.load %arg8[%c0_13, %c0_14] : memref<16x1xf32, #tpu.memory_space<vmem>>, vector<16x1xf32>
    %cst = arith.constant dense<0.000000e+00> : vector<8x512xf32>
    %9 = tpu.matmul %4, %1, %cst {dimension_numbers = #tpu.dot_dimension_numbers<[1], [0], [0], [1], [0, 0, 1, 1], [], []>} : vector<8x216xf32>, vector<216x512xf32>, vector<8x512xf32> -> vector<8x512xf32>
    %cst_15 = arith.constant dense<0.000000e+00> : vector<8xf32>
    %10 = vector.multi_reduction <add>, %9, %cst_15 [1] : vector<8x512xf32> to vector<8xf32>
    %11 = vector.shape_cast %10 : vector<8xf32> to vector<8x1xf32>
    %cst_16 = arith.constant 5.120000e+02 : f32
    %12 = vector.broadcast %cst_16 : f32 to vector<8x1xf32>
    %13 = arith.divf %11, %12 : vector<8x1xf32>
    %14 = vector.broadcast %13 : vector<8x1xf32> to vector<8x512xf32>
    %15 = arith.subf %9, %14 : vector<8x512xf32>
    %16 = arith.mulf %15, %15 : vector<8x512xf32>
    %cst_17 = arith.constant dense<0.000000e+00> : vector<8xf32>
    %17 = vector.multi_reduction <add>, %16, %cst_17 [1] : vector<8x512xf32> to vector<8xf32>
    %18 = vector.shape_cast %17 : vector<8xf32> to vector<8x1xf32>
    %cst_18 = arith.constant 5.120000e+02 : f32
    %19 = vector.broadcast %cst_18 : f32 to vector<8x1xf32>
    %20 = arith.divf %18, %19 : vector<8x1xf32>
    %cst_19 = arith.constant 9.99999974E-6 : f32
    %21 = vector.broadcast %cst_19 : f32 to vector<8x1xf32>
    %22 = arith.addf %20, %21 : vector<8x1xf32>
    %23 = math.rsqrt %22 : vector<8x1xf32>
    %24 = vector.broadcast %23 : vector<8x1xf32> to vector<8x512xf32>
    %25 = arith.mulf %15, %24 : vector<8x512xf32>
    %cst_20 = arith.constant dense<0.000000e+00> : vector<32x512xf32>
    %26 = tpu.matmul %5, %25, %cst_20 {dimension_numbers = #tpu.dot_dimension_numbers<[1], [0], [0], [1], [0, 0, 1, 1], [], []>} : vector<32x8xf32>, vector<8x512xf32>, vector<32x512xf32> -> vector<32x512xf32>
    %27 = vector.broadcast %6 : vector<32x1xf32> to vector<32x512xf32>
    %28 = arith.addf %26, %27 : vector<32x512xf32>
    %cst_21 = arith.constant 5.000000e-01 : f32
    %29 = vector.broadcast %cst_21 : f32 to vector<32x512xf32>
    %30 = arith.mulf %29, %28 : vector<32x512xf32>
    %cst_22 = arith.constant 0.707106769 : f32
    %31 = vector.broadcast %cst_22 : f32 to vector<32x512xf32>
    %32 = arith.mulf %28, %31 : vector<32x512xf32>
    %33 = math.absf %32 : vector<32x512xf32>
    %cst_23 = arith.constant 0.327591091 : f32
    %34 = vector.broadcast %cst_23 : f32 to vector<32x512xf32>
    %35 = arith.mulf %34, %33 : vector<32x512xf32>
    %cst_24 = arith.constant 1.000000e+00 : f32
    %36 = vector.broadcast %cst_24 : f32 to vector<32x512xf32>
    %37 = arith.addf %36, %35 : vector<32x512xf32>
    %cst_25 = arith.constant 1.000000e+00 : f32
    %38 = vector.broadcast %cst_25 : f32 to vector<32x512xf32>
    %39 = arith.divf %38, %37 : vector<32x512xf32>
    %cst_26 = arith.constant 1.06140542 : f32
    %40 = vector.broadcast %cst_26 : f32 to vector<32x512xf32>
    %41 = arith.mulf %40, %39 : vector<32x512xf32>
    %cst_27 = arith.constant -1.45315206 : f32
    %42 = vector.broadcast %cst_27 : f32 to vector<32x512xf32>
    %43 = arith.addf %41, %42 : vector<32x512xf32>
    %44 = arith.mulf %43, %39 : vector<32x512xf32>
    %cst_28 = arith.constant 1.42141378 : f32
    %45 = vector.broadcast %cst_28 : f32 to vector<32x512xf32>
    %46 = arith.addf %44, %45 : vector<32x512xf32>
    %47 = arith.mulf %46, %39 : vector<32x512xf32>
    %cst_29 = arith.constant -0.284496725 : f32
    %48 = vector.broadcast %cst_29 : f32 to vector<32x512xf32>
    %49 = arith.addf %47, %48 : vector<32x512xf32>
    %50 = arith.mulf %49, %39 : vector<32x512xf32>
    %cst_30 = arith.constant 0.254829586 : f32
    %51 = vector.broadcast %cst_30 : f32 to vector<32x512xf32>
    %52 = arith.addf %50, %51 : vector<32x512xf32>
    %53 = arith.mulf %52, %39 : vector<32x512xf32>
    %cst_31 = arith.constant 0.000000e+00 : f32
    %54 = vector.broadcast %cst_31 : f32 to vector<32x512xf32>
    %55 = arith.subf %54, %33 : vector<32x512xf32>
    %56 = arith.mulf %55, %33 : vector<32x512xf32>
    %57 = math.exp %56 : vector<32x512xf32>
    %58 = arith.mulf %53, %57 : vector<32x512xf32>
    %cst_32 = arith.constant 1.000000e+00 : f32
    %59 = vector.broadcast %cst_32 : f32 to vector<32x512xf32>
    %60 = arith.subf %59, %58 : vector<32x512xf32>
    %cst_33 = arith.constant 0.000000e+00 : f32
    %61 = vector.broadcast %cst_33 : f32 to vector<32x512xf32>
    %62 = arith.cmpf olt, %32, %61 : vector<32x512xf32>
    %cst_34 = arith.constant 0.000000e+00 : f32
    %63 = vector.broadcast %cst_34 : f32 to vector<32x512xf32>
    %64 = arith.subf %63, %60 : vector<32x512xf32>
    %65 = arith.select %62, %64, %60 : vector<32x512xi1>, vector<32x512xf32>
    %cst_35 = arith.constant 1.000000e+00 : f32
    %66 = vector.broadcast %cst_35 : f32 to vector<32x512xf32>
    %67 = arith.addf %66, %65 : vector<32x512xf32>
    %68 = arith.mulf %30, %67 : vector<32x512xf32>
    %cst_36 = arith.constant dense<0.000000e+00> : vector<16x512xf32>
    %69 = tpu.matmul %7, %68, %cst_36 {dimension_numbers = #tpu.dot_dimension_numbers<[1], [0], [0], [1], [0, 0, 1, 1], [], []>} : vector<16x32xf32>, vector<32x512xf32>, vector<16x512xf32> -> vector<16x512xf32>
    %70 = vector.broadcast %8 : vector<16x1xf32> to vector<16x512xf32>
    %71 = arith.addf %69, %70 : vector<16x512xf32>
    %c0_37 = arith.constant 0 : index
    %c0_38 = arith.constant 0 : index
    %72 = vector.load %arg7[%c0_37, %c0_38] : memref<16x8xf32, #tpu.memory_space<vmem>>, vector<16x8xf32>
    %cst_39 = arith.constant dense<0.000000e+00> : vector<16x512xf32>
    %73 = tpu.matmul %72, %3, %cst_39 {dimension_numbers = #tpu.dot_dimension_numbers<[1], [0], [0], [1], [0, 0, 1, 1], [], []>} : vector<16x8xf32>, vector<8x512xf32>, vector<16x512xf32> -> vector<16x512xf32>
    %74 = arith.addf %71, %73 : vector<16x512xf32>
    %c0_40 = arith.constant 0 : index
    %c0_41 = arith.constant 0 : index
    %c0_42 = arith.constant 0 : index
    %75 = vector.load %arg9[%c0_40, %c0_41, %c0_42] : memref<1x16x512xf32, #tpu.memory_space<vmem>>, vector<1x16x512xf32>
    %76 = vector.shape_cast %75 : vector<1x16x512xf32> to vector<16x512xf32>
    %77 = vector.shape_cast %74 : vector<16x512xf32> to vector<1x16x512xf32>
    tpu.vector_store %arg9[%c0_40, %c0_41, %c0_42], %77 {strides = array<i32>} : memref<1x16x512xf32, #tpu.memory_space<vmem>>, vector<1x16x512xf32>,
    return
  }
  func.func @transform_0(%arg0: i32) -> (i32, i32, i32) {
    %c0_i32 = arith.constant 0 : i32
    %c0_i32_0 = arith.constant 0 : i32
    %c0_i32_1 = arith.constant 0 : i32
    return %arg0, %c0_i32, %c0_i32_0 : i32, i32, i32
  }
  func.func @transform_1(%arg0: i32) -> (i32, i32, i32) {
    %c0_i32 = arith.constant 0 : i32
    %c0_i32_0 = arith.constant 0 : i32
    %c0_i32_1 = arith.constant 0 : i32
    return %arg0, %c0_i32, %c0_i32_0 : i32, i32, i32
  }
  func.func @transform_2(%arg0: i32) -> (i32, i32) {
    %c0_i32 = arith.constant 0 : i32
    %c0_i32_0 = arith.constant 0 : i32
    %c0_i32_1 = arith.constant 0 : i32
    return %c0_i32, %c0_i32_0 : i32, i32
  }
  func.func @transform_3(%arg0: i32) -> (i32, i32) {
    %c0_i32 = arith.constant 0 : i32
    %c0_i32_0 = arith.constant 0 : i32
    %c0_i32_1 = arith.constant 0 : i32
    return %c0_i32, %c0_i32_0 : i32, i32
  }
  func.func @transform_4(%arg0: i32) -> (i32, i32) {
    %c0_i32 = arith.constant 0 : i32
    %c0_i32_0 = arith.constant 0 : i32
    %c0_i32_1 = arith.constant 0 : i32
    return %c0_i32, %c0_i32_0 : i32, i32
  }
  func.func @transform_5(%arg0: i32) -> (i32, i32) {
    %c0_i32 = arith.constant 0 : i32
    %c0_i32_0 = arith.constant 0 : i32
    %c0_i32_1 = arith.constant 0 : i32
    return %c0_i32, %c0_i32_0 : i32, i32
  }
  func.func @transform_6(%arg0: i32) -> (i32, i32) {
    %c0_i32 = arith.constant 0 : i32
    %c0_i32_0 = arith.constant 0 : i32
    %c0_i32_1 = arith.constant 0 : i32
    return %c0_i32, %c0_i32_0 : i32, i32
  }
  func.func @transform_7(%arg0: i32) -> (i32, i32) {
    %c0_i32 = arith.constant 0 : i32
    %c0_i32_0 = arith.constant 0 : i32
    %c0_i32_1 = arith.constant 0 : i32
    return %c0_i32, %c0_i32_0 : i32, i32
  }
  func.func @transform_8(%arg0: i32) -> (i32, i32, i32) {
    %c0_i32 = arith.constant 0 : i32
    %c0_i32_0 = arith.constant 0 : i32
    %c0_i32_1 = arith.constant 0 : i32
    return %arg0, %c0_i32, %c0_i32_0 : i32, i32, i32
  }
}

</mosaic_0001>

<bundles_post_ra>
// kernel: tpu_custom_call.1
= control target key start
LH: loop header
LB: loop body
LE: loop exit
PB: predicated region body
PF: predicated region fallthrough
CT: control target
= control target key end

     0   :  { %13 = vsyncpa [#allocation3], 0  ;;  %s3299_s0 = inlined_call_operand.hbm [shape: f32[2,216,512], index: 0, kind: input, shape index: {}]   ;;  %s3300_s1 = inlined_call_operand.vmem [shape: f32[2,8,512], index: 1, kind: input, shape index: {}]   ;;  %s3301_s2 = inlined_call_operand.vmem [shape: f32[8,216], index: 2, kind: input, shape index: {}]   ;;  %s3302_s3 = inlined_call_operand.vmem [shape: f32[32,8], index: 3, kind: input, shape index: {}]   ;;  %s3303_s4 = inlined_call_operand.vmem [shape: f32[32,1], index: 4, kind: input, shape index: {}]   ;;  %s3304_s5 = inlined_call_operand.vmem [shape: f32[16,32], index: 5, kind: input, shape index: {}]   ;;  %s3305_s6 = inlined_call_operand.vmem [shape: f32[16,8], index: 6, kind: input, shape index: {}]   ;;  %s3306_s7 = inlined_call_operand.vmem [shape: f32[16,1], index: 7, kind: input, shape index: {}]   ;;  %s3307_s8 = inlined_call_operand.hbm [shape: f32[2,16,512], index: 8, kind: output, shape index: {}]  }
   0x1   :  { %15 = vsyncpa [#allocation3 + $0x1], 0 }
   0x2   :  { %16 = vsyncpa [#allocation4], 0 }
   0x3   :  { %18 = vsyncpa [#allocation4 + $0x1], 0  ;;  %s2123_s27 = smov 0   ;;  %s2125_s28 = smov 0  }
   0x4   :  { %s2127_s29 = smov 0   ;;  %s2129_s30 = smov 0  }
   0x5 LB: > { %3345 = sst [smem:[#allocation8_spill]] %s2066_s29  ;;  %s2144_s9 = sadd.s32 4294967295, %s2070_s30   ;;  %s2070_s30 = sphi %s2129_s30, %s3504_s30   ;;  %s2066_s29 = sphi %s2127_s29, %s3506_s29   ;;  %s2062_s28 = sphi %s2125_s28, %s3508_s28   ;;  %s2058_s27 = sphi %s2123_s27, %s3507_s27  }
   0x6   : > { %s1793_s10 = sadd.s32 4294967294, %s2070_s30   ;;  %s2148_s11 = sadd.s32 1, %s2070_s30  }
   0x7   : > { %3346 = sst [smem:[#allocation9_spill]] %s2148_s11  ;;  %s31_s12 = sadd.s32 1, %s2066_s29 }
   0x8   : > { %s28_s13 = ssub.s32 %s2070_s30, %s2148_s11  ;;  %p38_p0 = scmp.ne.s32.totalorder %s2066_s29, %s2062_s28 }
   0x9   : > { %p29_p1 = scmp.eq.s32.totalorder %s28_s13, 0  ;;  %p39_p2 = scmp.eq.s32.totalorder %s2070_s30, 0 }
   0xa   : > { %p44_p3 = scmp.ne.s32.totalorder %s2062_s28, %s2058_s27  ;;  %p45_p4 = scmp.eq.s32.totalorder %s2144_s9, 0 }
   0xb   : > { %s2160_s14 = scalar_select %p29_p1, %s2066_s29, %s31_s12  }
   0xc   : > { %p40_p5 = por %p39_p2, %p38_p0  ;;  %p2162_p6 = por %p45_p4, %p44_p3 }
   0xd   : > { %3347 = sst [smem:[#allocation10_spill]] %s2160_s14  ;;  %p220_p7 = scmp.eq.s32.totalorder %s2144_s9, 1 }
   0xe   : > { %p226_p8 = scmp.eq.s32.totalorder %s1793_s10, 1  ;;  %p1795_p9 = scmp.ge.s32.totalorder %s2070_s30, 2 }
   0xf   : > { %p1863_p10 = scmp.lt.s32.totalorder %s2070_s30, 2  ;;  %p2169_p11 = por %p220_p7, %p38_p0 }
  0x10   : > { %p2173_p12 = por %p226_p8, %p44_p3  ;;  %s264_s18 = sand.u32 1, %s2066_s29  }
  0x11   : > { %s1849_s19 = smul.u32 864, %s2070_s30  ;;  %p2182_p13 = pnand %p1863_p10, %p40_p5 }
  0x12   : > { %s1848_s20 = smul.u32 864, %s264_s18  ;;  %s265_s12 = scalar_lea.sflag [#allocation3], %s264_s18 }
  0x13   : > { %s273_s23 = scalar_lea.hbm %s3299_s0, %s1849_s19  ;;  %p1978_p1 = pneg %p2182_p13 }
  0x14   : > { %s274_s25 = sshll.u32 %s273_s23, 4  ;;  %s268_s26 = scalar_lea.vmem [#allocation2], %s1848_s20  ;;  %s275_s25 = int_to_ptr.hbm [resolvable:$true] %s274_s25 }
  0x15   : > { %s276_s10 = sshll.u32 %s268_s26, 4  ;;  %s1974_s13 = sshra.s32 %s275_s25, 4  ;;  %s277_s10 = int_to_ptr.vmem [resolvable:$true] %s276_s10  ;;  %s1975_s13 = int_to_ptr.hbm [resolvable:$true] %s1974_s13 }
  0x16   : > { %s1976_s14 = scalar_lea.hbm %s1975_s13, 864  ;;  %s1981_s22 = scalar_lea.hbm %s3299_s0, 1728 }
  0x17   : > { %p1977_p0 = scmp.ne.s32.totalorder %s1975_s13, %s1976_s14  ;;  %p1982_p4 = scmp.lt.s32.totalorder %s1975_s13, %s3299_s0 }
  0x18   : > { %p1983_p5 = scmp.lt.s32.totalorder %s1981_s22, %s1976_s14 }
  0x19   : > { %p1979_p2 = pnand %p1978_p1, %p1977_p0 }
  0x1a   : > { %p1984_p7 = por %p1983_p5, %p1982_p4 }
  0x1b   : > { %p1980_p3 = pneg %p1979_p2 }
  0x1d   : > { %p1985_p8 = pnand %p1984_p7, %p1980_p3 }
  0x1f   : > { %1988 = shalt.err (!%p1985_p8)
}
  0x20   : > { %s2072_s18 = smov 512   ;;  %s2073_s20 = smov 32  }
  0x21   : > { %1858 = dma.hbm_to_vmem [thread:$0]  (!%p2182_p13), %s275_s25, 13824, %s277_s10, %s265_s12, %s2072_s18, %s2072_s18, %s2073_s20  }
  0x22   : > { %p1797_p10 = scmp.ge.s32.totalorder %s2070_s30, 1  ;;  %p292_p0 = scmp.lt.s32.totalorder %s2070_s30, 3 }
  0x24   : > { %p293_p1 = pnand %p1797_p10, %p292_p0 }
  0x26   : > { %296 = sbr.rel (%p293_p1) target bundleno = 976 (0x3d0), region = 52 }
  0x2b   : > { %s2199_s23 = sand.u32 1, %s2062_s28  }
  0x2c   : > { %s1850_s29 = smul.u32 864, %s2199_s23  ;;  %s299_s11 = scalar_lea.sflag [#allocation3], %s2199_s23 }
  0x2e   : > { %s2203_s14 = scalar_lea.vmem [#allocation2], %s1850_s29 }
  0x2f   : > { %2049 = dma.done.wait (%p2162_p6), %s299_s11, 13824  }
  0x30   : > { %2051 = vsyncadd (%p2162_p6), %s299_s11, 4294953472  ;;  %v406_v0 = vld [vmem:[%s2203_s14 + $0x1e0] sm:$0xff]  ;;  %v407_v4 = vld [vmem:[%s2203_s14 + $0x1e8] sm:$0xff]  ;;  %vm472_vm0 = vcmask 719872   ;;  %vm698_vm5 = vcmask 64512   ;;  %p341_p6 = scmp.lt.s32.totalorder %s2144_s9, 1 }
  0x31   : > { %v402_v1 = vld [vmem:[%s2203_s14 + $0x1c0] sm:$0xff]  ;;  %476 = vmatpush.msra.mxu0 %v406_v0  ;;  %516 = vmatpush.msra.mxu2 %v407_v4  ;;  %v403_v7 = vld [vmem:[%s2203_s14 + $0x1c8] sm:$0xff]  ;;  %v408_v41 = vld [vmem:[%s2203_s14 + $0x1f0] sm:$0xff]  ;;  %s1798_s19 = sshll.u32 %s2199_s23, 6  ;;  %s1843_s22 = sshll.u32 %s2144_s9, 6 }
  0x32   : > { %v450_v2 = vld [vmem:[%s2203_s14 + $0x340] sm:$0xff]  ;;  %v451_v9 = vld [vmem:[%s2203_s14 + $0x348] sm:$0xff]  ;;  %v404_v45 = vld [vmem:[%s2203_s14 + $0x1d0] sm:$0xff]  ;;  %s3136_s20 = scalar_select %p341_p6, %s2144_s9, 1 }
  0x33   : > { %501 = vmatpush.msra.mxu1 %v450_v2  ;;  %v446_v3 = vld [vmem:[%s2203_s14 + $0x320] sm:$0xff]  ;;  %477 = vmatpush.msra.mxu0 %v402_v1  ;;  %v399_v11 = vld [vmem:[%s2203_s14 + $0x1a8] sm:$0xff]  ;;  %v400_v49 = vld [vmem:[%s2203_s14 + $0x1b0] sm:$0xff]  ;;  %s3255_s21 = scalar_lea.vmem [#allocation5], %s1798_s19  ;;  %s2024_s10 = scalar_lea.hbm %s3307_s8, 128 }
  0x34   : > { %v398_v5 = vld [vmem:[%s2203_s14 + $0x1a0] sm:$0xff]  ;;  %517 = vmatpush.msra.mxu2 %v403_v7  ;;  %541 = vmatpush.msra.mxu3 %v451_v9  ;;  %v447_v12 = vld [vmem:[%s2203_s14 + $0x328] sm:$0xff]  ;;  %v452_v50 = vld [vmem:[%s2203_s14 + $0x350] sm:$0xff]  ;;  %s1842_s29 = sshll.u32 %s3136_s20, 5  ;;  %s1705_s11 = sshll.u32 %s3255_s21, 4  ;;  %s1706_s11 = int_to_ptr.vmem [resolvable:$true] %s1705_s11 }
  0x35   : > { %v442_v6 = vld [vmem:[%s2203_s14 + $0x300] sm:$0xff]  ;;  %502 = vmatpush.msra.mxu1 %v446_v3  ;;  %478 = vmatpush.msra.mxu0 %v398_v5  ;;  %v395_v13 = vld [vmem:[%s2203_s14 + $0x188] sm:$0xff]  ;;  %v396_v53 = vld [vmem:[%s2203_s14 + $0x190] sm:$0xff]  ;;  %s3166_s15 = scalar_lea.vmem %s3300_s1, %s1842_s29  ;;  %s1704_s29 = scalar_lea.hbm %s3307_s8, %s1843_s22 }
  0x36   : > { %v394_v8 = vld [vmem:[%s2203_s14 + $0x180] sm:$0xff]  ;;  %v443_v14 = vld [vmem:[%s2203_s14 + $0x308] sm:$0xff]  ;;  %518 = vmatpush.msra.mxu2 %v399_v11  ;;  %542 = vmatpush.msra.mxu3 %v447_v12  ;;  %v448_v54 = vld [vmem:[%s2203_s14 + $0x330] sm:$0xff] }
  0x37   : > { %v438_v10 = vld [vmem:[%s2203_s14 + $0x2e0] sm:$0xff]  ;;  %503 = vmatpush.msra.mxu1 %v442_v6  ;;  %479 = vmatpush.msra.mxu0 %v394_v8  ;;  %v391_v17 = vld [vmem:[%s2203_s14 + $0x168] sm:$0xff]  ;;  %v392_v57 = vld [vmem:[%s2203_s14 + $0x170] sm:$0xff] }
  0x38   : > { %v390_v15 = vld [vmem:[%s2203_s14 + $0x160] sm:$0xff]  ;;  %v439_v18 = vld [vmem:[%s2203_s14 + $0x2e8] sm:$0xff]  ;;  %519 = vmatpush.msra.mxu2 %v395_v13  ;;  %543 = vmatpush.msra.mxu3 %v443_v14  ;;  %v444_v58 = vld [vmem:[%s2203_s14 + $0x310] sm:$0xff] }
  0x39   : > { %v434_v16 = vld [vmem:[%s2203_s14 + $0x2c0] sm:$0xff]  ;;  %504 = vmatpush.msra.mxu1 %v438_v10  ;;  %480 = vmatpush.msra.mxu0 %v390_v15  ;;  %v387_v21 = vld [vmem:[%s2203_s14 + $0x148] sm:$0xff]  ;;  %v409_v61 = vld [vmem:[%s2203_s14 + $0x1f8] sm:$0xff] }
  0x3a   : > { %v386_v19 = vld [vmem:[%s2203_s14 + $0x140] sm:$0xff]  ;;  %v435_v22 = vld [vmem:[%s2203_s14 + $0x2c8] sm:$0xff]  ;;  %520 = vmatpush.msra.mxu2 %v391_v17  ;;  %544 = vmatpush.msra.mxu3 %v439_v18  ;;  %v388_v62 = vld [vmem:[%s2203_s14 + $0x150] sm:$0xff] }
  0x3b   : > { %v430_v20 = vld [vmem:[%s2203_s14 + $0x2a0] sm:$0xff]  ;;  %505 = vmatpush.msra.mxu1 %v434_v16  ;;  %481 = vmatpush.msra.mxu0 %v386_v19  ;;  %v383_v25 = vld [vmem:[%s2203_s14 + $0x128] sm:$0xff]  ;;  %v440_v63 = vld [vmem:[%s2203_s14 + $0x2f0] sm:$0xff] }
  0x3c   : > { %v382_v23 = vld [vmem:[%s2203_s14 + $0x120] sm:$0xff]  ;;  %v431_v26 = vld [vmem:[%s2203_s14 + $0x2a8] sm:$0xff]  ;;  %521 = vmatpush.msra.mxu2 %v387_v21  ;;  %545 = vmatpush.msra.mxu3 %v435_v22  ;;  %v405_v1 = vld [vmem:[%s2203_s14 + $0x1d8] sm:$0xff] }
  0x3d   : > { %v426_v24 = vld [vmem:[%s2203_s14 + $0x280] sm:$0xff]  ;;  %506 = vmatpush.msra.mxu1 %v430_v20  ;;  %482 = vmatpush.msra.mxu0 %v382_v23  ;;  %v379_v29 = vld [vmem:[%s2203_s14 + $0x108] sm:$0xff]  ;;  %v384_v2 = vld [vmem:[%s2203_s14 + $0x130] sm:$0xff] }
  0x3e   : > { %v378_v27 = vld [vmem:[%s2203_s14 + $0x100] sm:$0xff]  ;;  %v427_v30 = vld [vmem:[%s2203_s14 + $0x288] sm:$0xff]  ;;  %522 = vmatpush.msra.mxu2 %v383_v25  ;;  %546 = vmatpush.msra.mxu3 %v431_v26  ;;  %v436_v3 = vld [vmem:[%s2203_s14 + $0x2d0] sm:$0xff] }
  0x3f   : > { %v422_v28 = vld [vmem:[%s2203_s14 + $0x260] sm:$0xff]  ;;  %507 = vmatpush.msra.mxu1 %v426_v24  ;;  %483 = vmatpush.msra.mxu0 %v378_v27  ;;  %v375_v33 = vld [vmem:[%s2203_s14 + $0xe8] sm:$0xff]  ;;  %v453_v4 = vld [vmem:[%s2203_s14 + $0x358] sm:$0xff] }
  0x40   : > { %v374_v31 = vld [vmem:[%s2203_s14 + $0xe0] sm:$0xff]  ;;  %v423_v34 = vld [vmem:[%s2203_s14 + $0x268] sm:$0xff]  ;;  %523 = vmatpush.msra.mxu2 %v379_v29  ;;  %547 = vmatpush.msra.mxu3 %v427_v30  ;;  %v401_v5 = vld [vmem:[%s2203_s14 + $0x1b8] sm:$0xff] }
  0x41   : > { %v418_v32 = vld [vmem:[%s2203_s14 + $0x240] sm:$0xff]  ;;  %508 = vmatpush.msra.mxu1 %v422_v28  ;;  %484 = vmatpush.msra.mxu0 %v374_v31  ;;  %v371_v37 = vld [vmem:[%s2203_s14 + $0xc8] sm:$0xff]  ;;  %v380_v6 = vld [vmem:[%s2203_s14 + $0x110] sm:$0xff] }
  0x42   : > { %v370_v35 = vld [vmem:[%s2203_s14 + $0xc0] sm:$0xff]  ;;  %v419_v38 = vld [vmem:[%s2203_s14 + $0x248] sm:$0xff]  ;;  %524 = vmatpush.msra.mxu2 %v375_v33  ;;  %548 = vmatpush.msra.mxu3 %v423_v34  ;;  %v432_v7 = vld [vmem:[%s2203_s14 + $0x2b0] sm:$0xff] }
  0x43   : > { %v414_v36 = vld [vmem:[%s2203_s14 + $0x220] sm:$0xff]  ;;  %509 = vmatpush.msra.mxu1 %v418_v32  ;;  %485 = vmatpush.msra.mxu0 %v370_v35  ;;  %v367_v42 = vld [vmem:[%s2203_s14 + $0xa8] sm:$0xff]  ;;  %v449_v8 = vld [vmem:[%s2203_s14 + $0x338] sm:$0xff] }
  0x44   : > { %v366_v39 = vld [vmem:[%s2203_s14 + $0xa0] sm:$0xff]  ;;  %525 = vmatpush.msra.mxu2 %v371_v37  ;;  %549 = vmatpush.msra.mxu3 %v419_v38  ;;  %v415_v44 = vld [vmem:[%s2203_s14 + $0x228] sm:$0xff]  ;;  %v397_v9 = vld [vmem:[%s2203_s14 + $0x198] sm:$0xff] }
  0x45   : > { %v410_v40 = vld [vmem:[%s2203_s14 + $0x200] sm:$0xff]  ;;  %510 = vmatpush.msra.mxu1 %v414_v36  ;;  %486 = vmatpush.msra.mxu0 %v366_v39  ;;  %v363_v46 = vld [vmem:[%s2203_s14 + $0x88] sm:$0xff]  ;;  %v376_v10 = vld [vmem:[%s2203_s14 + $0xf0] sm:$0xff] }
  0x46   : > { %v362_v43 = vld [vmem:[%s2203_s14 + $0x80] sm:$0xff]  ;;  %526 = vmatpush.msra.mxu2 %v367_v42  ;;  %v411_v48 = vld [vmem:[%s2203_s14 + $0x208] sm:$0xff]  ;;  %550 = vmatpush.msra.mxu3 %v415_v44  ;;  %v428_v11 = vld [vmem:[%s2203_s14 + $0x290] sm:$0xff] }
  0x47   : > { %511 = vmatpush.msra.mxu1 %v410_v40  ;;  %v358_v47 = vld [vmem:[%s2203_s14 + $0x60] sm:$0xff]  ;;  %487 = vmatpush.msra.mxu0 %v362_v43  ;;  %v359_v52 = vld [vmem:[%s2203_s14 + $0x68] sm:$0xff]  ;;  %v445_v12 = vld [vmem:[%s2203_s14 + $0x318] sm:$0xff] }
  0x48   : > { %v354_v51 = vld [vmem:[%s2203_s14 + $0x40] sm:$0xff]  ;;  %527 = vmatpush.msra.mxu2 %v363_v46  ;;  %551 = vmatpush.msra.mxu3 %v411_v48  ;;  %v355_v56 = vld [vmem:[%s2203_s14 + $0x48] sm:$0xff]  ;;  %v393_v13 = vld [vmem:[%s2203_s14 + $0x178] sm:$0xff] }
  0x49   : > { %556 = vmatpush.msrb.mxu1 %v408_v41  ;;  %488 = vmatpush.msra.mxu0 %v358_v47  ;;  %v350_v55 = vld [vmem:[%s2203_s14 + $0x20] sm:$0xff]  ;;  %v351_v60 = vld [vmem:[%s2203_s14 + $0x28] sm:$0xff]  ;;  %v372_v15 = vld [vmem:[%s2203_s14 + $0xd0] sm:$0xff] }
  0x4a   : > { %581 = vmatpush.msrb.mxu3 %v452_v50  ;;  %528 = vmatpush.msra.mxu2 %v359_v52  ;;  %v346_v59 = vld [vmem:[%s2203_s14] sm:$0xff]  ;;  %v347_v0 = vld [vmem:[%s2203_s14 + $0x8] sm:$0xff]  ;;  %v424_v16 = vld [vmem:[%s2203_s14 + $0x270] sm:$0xff] }
  0x4b   : > { %557 = vmatpush.msrb.mxu1 %v404_v45  ;;  %489 = vmatpush.msra.mxu0 %v354_v51  ;;  %v2290_v14 = vld [vmem:[%s3301_s2 + $0x8] sm:$0xff]  ;;  %v389_v17 = vld [vmem:[%s2203_s14 + $0x158] sm:$0xff]  ;;  %v368_v19 = vld [vmem:[%s2203_s14 + $0xb0] sm:$0xff] }
  0x4c   : > { %582 = vmatpush.msrb.mxu3 %v448_v54  ;;  %529 = vmatpush.msra.mxu2 %v355_v56  ;;  %v441_v18 = vld [vmem:[%s2203_s14 + $0x2f8] sm:$0xff]  ;;  %v420_v20 = vld [vmem:[%s2203_s14 + $0x250] sm:$0xff]  ;;  %v458_v27 = vld [vmem:[%s3301_s2] sm:$0xff] }
  0x4d   : > { %558 = vmatpush.msrb.mxu1 %v400_v49  ;;  %490 = vmatpush.msra.mxu0 %v350_v55  ;;  %v385_v21 = vld [vmem:[%s2203_s14 + $0x138] sm:$0xff]  ;;  %v364_v23 = vld [vmem:[%s2203_s14 + $0x90] sm:$0xff] }
  0x4e   : > { %583 = vmatpush.msrb.mxu3 %v444_v58  ;;  %530 = vmatpush.msra.mxu2 %v351_v60  ;;  %v437_v22 = vld [vmem:[%s2203_s14 + $0x2d8] sm:$0xff]  ;;  %v416_v24 = vld [vmem:[%s2203_s14 + $0x230] sm:$0xff] }
  0x4f   : > { %559 = vmatpush.msrb.mxu1 %v396_v53  ;;  %491 = vmatpush.msra.mxu0 %v346_v59  ;;  %v381_v25 = vld [vmem:[%s2203_s14 + $0x118] sm:$0xff]  ;;  %v360_v28 = vld [vmem:[%s2203_s14 + $0x70] sm:$0xff] }
  0x50   : > { %584 = vmatpush.msrb.mxu3 %v440_v63  ;;  %531 = vmatpush.msra.mxu2 %v347_v0  ;;  %v433_v26 = vld [vmem:[%s2203_s14 + $0x2b8] sm:$0xff]  ;;  %v412_v29 = vld [vmem:[%s2203_s14 + $0x210] sm:$0xff] }
  0x51   : > { %560 = vmatpush.msrb.mxu1 %v392_v57  ;;  %596 = vmatpush.msrb.mxu0 %v409_v61  ;;  %v377_v30 = vld [vmem:[%s2203_s14 + $0xf8] sm:$0xff]  ;;  %v356_v32 = vld [vmem:[%s2203_s14 + $0x50] sm:$0xff]  ;;  %v2074_v61 = vmov 512.0  }
  0x52   : > { %585 = vmatpush.msrb.mxu3 %v436_v3  ;;  %621 = vmatpush.msrb.mxu2 %v453_v4  ;;  %v429_v31 = vld [vmem:[%s2203_s14 + $0x298] sm:$0xff]  ;;  %v352_v35 = vld [vmem:[%s2203_s14 + $0x30] sm:$0xff]  ;;  %1906 = vrcp.f32 %v2074_v61 }
  0x53   : > { %561 = vmatpush.msrb.mxu1 %v388_v62  ;;  %597 = vmatpush.msrb.mxu0 %v405_v1  ;;  %v373_v33 = vld [vmem:[%s2203_s14 + $0xd8] sm:$0xff]  ;;  %v348_v38 = vld [vmem:[%s2203_s14 + $0x10] sm:$0xff] }
  0x54   : > { %586 = vmatpush.msrb.mxu3 %v432_v7  ;;  %622 = vmatpush.msrb.mxu2 %v449_v8  ;;  %v425_v34 = vld [vmem:[%s2203_s14 + $0x278] sm:$0xff] }
  0x55   : > { %562 = vmatpush.msrb.mxu1 %v384_v2  ;;  %598 = vmatpush.msrb.mxu0 %v401_v5  ;;  %v369_v36 = vld [vmem:[%s2203_s14 + $0xb8] sm:$0xff] }
  0x56   : > { %587 = vmatpush.msrb.mxu3 %v428_v11  ;;  %623 = vmatpush.msrb.mxu2 %v445_v12  ;;  %v421_v37 = vld [vmem:[%s2203_s14 + $0x258] sm:$0xff] }
  0x57   : > { %563 = vmatpush.msrb.mxu1 %v380_v6  ;;  %599 = vmatpush.msrb.mxu0 %v397_v9  ;;  %v365_v39 = vld [vmem:[%s2203_s14 + $0x98] sm:$0xff] }
  0x58   : > { %1802 = vmatmul.msk.f32.vlgmr.msra.gmra.mxu3 %vm472_vm0, %v2290_v14  ;;  %624 = vmatpush.msrb.mxu2 %v441_v18  ;;  %v417_v40 = vld [vmem:[%s2203_s14 + $0x238] sm:$0xff]  ;;  %v1907_v62 = vpop.eup %1906 }
  0x59   : > { %564 = vmatpush.msrb.mxu1 %v376_v10  ;;  %600 = vmatpush.msrb.mxu0 %v393_v13  ;;  %v361_v41 = vld [vmem:[%s2203_s14 + $0x78] sm:$0xff]  ;;  %v642_v63 = vmul.f32 512.0, %v1907_v62  ;;  %vm646_vm1 = vweird.f32 %v1907_v62 }
  0x5a   : > { %588 = vmatpush.msrb.mxu3 %v424_v16  ;;  %625 = vmatpush.msrb.mxu2 %v437_v22  ;;  %v413_v42 = vld [vmem:[%s2203_s14 + $0x218] sm:$0xff] }
  0x5b   : > { %565 = vmatpush.msrb.mxu1 %v372_v15  ;;  %601 = vmatpush.msrb.mxu0 %v389_v17  ;;  %v357_v43 = vld [vmem:[%s2203_s14 + $0x58] sm:$0xff]  ;;  %v643_v0 = vsub.f32 1.0, %v642_v63 }
  0x5c   : > { %589 = vmatpush.msrb.mxu3 %v420_v20  ;;  %626 = vmatpush.msrb.mxu2 %v433_v26  ;;  %v353_v44 = vld [vmem:[%s2203_s14 + $0x38] sm:$0xff] }
  0x5d   : > { %566 = vmatpush.msrb.mxu1 %v368_v19  ;;  %602 = vmatpush.msrb.mxu0 %v385_v21  ;;  %v349_v45 = vld [vmem:[%s2203_s14 + $0x18] sm:$0xff]  ;;  %v644_v1 = vmul.f32 %v1907_v62, %v643_v0  ;;  %s1707_s14 = sshll.u32 %s1704_s29, 4  ;;  %s1708_s14 = int_to_ptr.hbm [resolvable:$true] %s1707_s14 }
  0x5e   : > { %590 = vmatpush.msrb.mxu3 %v416_v24  ;;  %1801 = vmatmul.msk.f32.vlgmr.msra.gmra.mxu1 %vm472_vm0, %v2290_v14  ;;  %v467_v22 = vld [vmem:[%s3303_s4 + $0x18] sm:$0xff]  ;;  %s2018_s24 = sshra.s32 %s1708_s14, 4  ;;  %s2019_s24 = int_to_ptr.hbm [resolvable:$true] %s2018_s24 }
  0x5f   : > { %567 = vmatpush.msrb.mxu1 %v364_v23  ;;  %603 = vmatpush.msrb.mxu0 %v381_v25  ;;  %v645_v2 = vadd.f32 %v1907_v62, %v644_v1  ;;  %v2075_v23 = vmov 0   ;;  %s2020_s25 = scalar_lea.hbm %s2019_s24, 64  ;;  %p2025_p4 = scmp.lt.s32.totalorder %s2019_s24, %s3307_s8 }
  0x60   : > { %532 = vmatmul.f32.vlgmr.msra.gmra.mxu2 %v458_v27  ;;  %591 = vmatpush.msrb.mxu3 %v412_v29  ;;  %v465_v29 = vld [vmem:[%s3303_s4 + $0x8] sm:$0xff]  ;;  %p2021_p13 = scmp.ne.s32.totalorder %s2019_s24, %s2020_s25  ;;  %p2026_p5 = scmp.lt.s32.totalorder %s2024_s10, %s2020_s25 }
  0x61   : > { %568 = vmatpush.msrb.mxu1 %v360_v28  ;;  %604 = vmatpush.msrb.mxu0 %v377_v30  ;;  %v647_v3 = vsel %vm646_vm1, %v1907_v62, %v645_v2  ;;  %v466_v28 = vld [vmem:[%s3303_s4 + $0x10] sm:$0xff] }
  0x62   : > { %627 = vmatpush.msrb.mxu2 %v429_v31  ;;  %1803 = vmatmul.msk.f32.vlgmr.msrb.gmra.mxu3 %vm472_vm0, %v2290_v14  ;;  %p2022_p2 = pnand %p2021_p13, %p2169_p11  ;;  %p2027_p7 = por %p2026_p5, %p2025_p4 }
  0x63   : > { %569 = vmatpush.msrb.mxu1 %v356_v32  ;;  %605 = vmatpush.msrb.mxu0 %v373_v33 }
  0x64   : > { %628 = vmatpush.msrb.mxu2 %v425_v34  ;;  %492 = vmatmul.f32.vlgmr.msra.gmra.mxu0 %v458_v27  ;;  %p2023_p3 = pneg %p2022_p2 }
  0x65   : > { %570 = vmatpush.msrb.mxu1 %v352_v35  ;;  %606 = vmatpush.msrb.mxu0 %v369_v36  ;;  %v460_v35 = vld [vmem:[%s3302_s3] sm:$0xff] }
  0x66   : > { %629 = vmatpush.msrb.mxu2 %v421_v37  ;;  %1903 = vset.pattern.permute.xlu1 %v2075_v23  ;;  %v464_v36 = vld [vmem:[%s3303_s4] sm:$0xff]  ;;  %v471_v37 = vld [vmem:[%s3306_s7 + $0x8] sm:$0xff]  ;;  %p2028_p8 = pnand %p2027_p7, %p2023_p3 }
  0x67   : > { %571 = vmatpush.msrb.mxu1 %v348_v38  ;;  %607 = vmatpush.msrb.mxu0 %v365_v39  ;;  %v461_v38 = vld [vmem:[%s3302_s3 + $0x8] sm:$0xff]  ;;  %v462_v39 = vld [vmem:[%s3302_s3 + $0x10] sm:$0xff] }
  0x68   : > { %630 = vmatpush.msrb.mxu2 %v417_v40  ;;  %572 = vmatmul.f32.vlgmr.msrb.gmra.mxu1 %v458_v27  ;;  %v463_v40 = vld [vmem:[%s3302_s3 + $0x18] sm:$0xff] }
  0x69   : > { %608 = vmatpush.msrb.mxu0 %v361_v41  ;;  %1904 = vset.pattern.permute.xlu2 %v2075_v23 }
  0x6a   : > { %631 = vmatpush.msrb.mxu2 %v413_v42  ;;  %695 = vperm.xlu1 %1903, %v467_v22  }
  0x6b   : > { %1804 = vmatmul.msk.f32.vlgmr.msrb.gmra.mxu2 %vm472_vm0, %v2290_v14  ;;  %609 = vmatpush.msrb.mxu0 %v357_v43 }
  0x6c   : > { %1905 = vset.pattern.permute.xlu0 %v2075_v23  ;;  %685 = vperm.xlu2 %1904, %v465_v29  }
  0x6d   : > { %610 = vmatpush.msrb.mxu0 %v353_v44 }
  0x6f   : > { %611 = vmatpush.msrb.mxu0 %v349_v45 }
  0x70   : > { %612 = vmatmul.f32.vlgmr.msrb.gmra.mxu0 %v458_v27 }
  0x72   : > { %690 = vperm.xlu1 %1903, %v466_v28  }
  0x74   : > { %680 = vperm.xlu2 %1904, %v464_v36  }
  0x7a   : > { %1474 = vperm.xlu1 %1903, %v471_v37  }
  0xc6   : > { %v686_v41 = vpop.permute.xlu2 %685 }
  0xce   : > { %v681_v42 = vpop.permute.xlu2 %680 }
  0xdb   : > { %v513_v46 = vpop.f32.mrf.mxu1  ;;  %v553_v47 = vpop.f32.mrf.mxu3 }
  0xe1   : > { %v493_v48 = vpop.f32.mrf.mxu0 }
  0xe2   : > { %v514_v50 = vadd.f32 %v513_v46, %v493_v48 }
  0xe3   : > { %v533_v49 = vpop.f32.mrf.mxu2 }
  0xe4   : > { %v554_v51 = vadd.f32 %v553_v47, %v533_v49 }
  0xe5   : > { %v573_v52 = vpop.f32.mrf.mxu1  ;;  %v593_v53 = vpop.f32.mrf.mxu3 }
  0xe6   : > { %v636_v54 = vadd.f32 %v554_v51, %v514_v50  ;;  %v594_v55 = vadd.f32 %v593_v53, %v573_v52 }
  0xe8   : > { %v637_v59 = vadd.f32 %v636_v54, %v594_v55 }
  0xed   : > { %v613_v56 = vpop.f32.mrf.mxu0 }
  0xee   : > { %v633_v57 = vpop.f32.mrf.mxu2 }
  0xef   : > { %v634_v58 = vadd.f32 %v633_v57, %v613_v56 }
  0xf1   : > { %v638_v60 = vadd.f32 %v637_v59, %v634_v58 }
  0xf3   : > { %639 = vadd.xlane.f32.xlu0 %v638_v60 }
 0x166   : > { %v640_v4 = vpop.xlane.xlu0 %639 }
 0x167   : > { %v648_v5 = vmul.f32 %v647_v3, %v640_v4 }
 0x169   : > { %v649_v6 = vsub.f32 %v514_v50, %v648_v5  ;;  %v650_v7 = vsub.f32 %v554_v51, %v648_v5  ;;  %v651_v8 = vsub.f32 %v594_v55, %v648_v5  ;;  %v652_v9 = vsub.f32 %v634_v58, %v648_v5 }
 0x16b   : > { %v653_v10 = vmul.f32 %v649_v6, %v649_v6  ;;  %v654_v11 = vmul.f32 %v650_v7, %v650_v7  ;;  %v655_v12 = vmul.f32 %v651_v8, %v651_v8  ;;  %v656_v14 = vmul.f32 %v652_v9, %v652_v9 }
 0x16d   : > { %v657_v13 = vadd.f32 %v654_v11, %v653_v10 }
 0x16f   : > { %v658_v15 = vadd.f32 %v657_v13, %v655_v12 }
 0x171   : > { %v659_v16 = vadd.f32 %v658_v15, %v656_v14 }
 0x173   : > { %660 = vadd.xlane.f32.xlu0 %v659_v16 }
 0x1e6   : > { %v661_v17 = vpop.xlane.xlu0 %660 }
 0x1e7   : > { %v662_v18 = vmul.f32 %v661_v17, %v647_v3 }
 0x1e9   : > { %v663_v19 = vadd.f32 1e-05, %v662_v18 }
 0x1eb   : > { %1908 = vrsqrt.f32 %v663_v19  ;;  %vm670_vm3 = vweird.f32 %v663_v19 }
 0x1f1   : > { %v1909_v20 = vpop.eup %1908 }
 0x1f2   : > { %v665_v21 = vmul.f32 %v1909_v20, %v663_v19  ;;  %vm671_vm2 = vweird.f32 %v1909_v20 }
 0x1f3   : > { %vm672_vm4 = vmor %vm670_vm3, %vm671_vm2 }
 0x1f4   : > { %v666_v24 = vmul.f32 %v1909_v20, %v665_v21 }
 0x1f6   : > { %v667_v25 = vmul.f32 0.5, %v666_v24 }
 0x1f8   : > { %v668_v26 = vsub.f32 1.5, %v667_v25 }
 0x1fa   : > { %v669_v27 = vmul.f32 %v1909_v20, %v668_v26 }
 0x1fc   : > { %v673_v30 = vsel %vm672_vm4, %v1909_v20, %v669_v27 }
 0x1fd   : > { %v674_v31 = vmul.f32 %v673_v30, %v649_v6  ;;  %v675_v32 = vmul.f32 %v673_v30, %v650_v7  ;;  %v676_v33 = vmul.f32 %v673_v30, %v651_v8  ;;  %v677_v34 = vmul.f32 %v673_v30, %v652_v9  ;;  %v2406_v8 = vpop.permute.xlu1 %695 }
 0x1ff   : > { %726 = vmatpush.msra.mxu3 %v674_v31  ;;  %755 = vmatpush.msra.mxu1 %v675_v32 }
 0x200   : > { %784 = vmatpush.msra.mxu2 %v676_v33  ;;  %813 = vmatpush.msra.mxu0 %v677_v34 }
 0x201   : > { %1805 = vmatmul.msk.f32.vlgmr.msra.gmra.mxu3 %vm698_vm5, %v460_v35  ;;  %1809 = vmatmul.msk.f32.vlgmr.msra.gmra.mxu1 %vm698_vm5, %v460_v35 }
 0x202   : > { %1813 = vmatmul.msk.f32.vlgmr.msra.gmra.mxu2 %vm698_vm5, %v460_v35  ;;  %1817 = vmatmul.msk.f32.vlgmr.msra.gmra.mxu0 %vm698_vm5, %v460_v35 }
 0x209   : > { %1806 = vmatmul.msk.f32.gmra.mxu3 %vm698_vm5, %v461_v38  ;;  %1810 = vmatmul.msk.f32.gmra.mxu1 %vm698_vm5, %v461_v38 }
 0x20a   : > { %1814 = vmatmul.msk.f32.gmra.mxu2 %vm698_vm5, %v461_v38  ;;  %1818 = vmatmul.msk.f32.gmra.mxu0 %vm698_vm5, %v461_v38 }
 0x211   : > { %1807 = vmatmul.msk.f32.gmra.mxu3 %vm698_vm5, %v462_v39  ;;  %1811 = vmatmul.msk.f32.gmra.mxu1 %vm698_vm5, %v462_v39 }
 0x212   : > { %1815 = vmatmul.msk.f32.gmra.mxu2 %vm698_vm5, %v462_v39  ;;  %1819 = vmatmul.msk.f32.gmra.mxu0 %vm698_vm5, %v462_v39 }
 0x219   : > { %1808 = vmatmul.msk.f32.gmra.mxu3 %vm698_vm5, %v463_v40  ;;  %1812 = vmatmul.msk.f32.gmra.mxu1 %vm698_vm5, %v463_v40 }
 0x21a   : > { %1816 = vmatmul.msk.f32.gmra.mxu2 %vm698_vm5, %v463_v40  ;;  %1820 = vmatmul.msk.f32.gmra.mxu0 %vm698_vm5, %v463_v40 }
 0x27e   : > { %v757_v43 = vpop.f32.mrf.mxu1 }
 0x27f   : > { %v758_v44 = vadd.f32 %v757_v43, %v681_v42  ;;  %v815_v45 = vpop.f32.mrf.mxu0 }
 0x280   : > { %v2376_v46 = vadd.f32 %v815_v45, %v681_v42  ;;  %v691_v45 = vpop.permute.xlu1 %690 }
 0x281   : > { %v2378_v47 = vmul.f32 0.70710677, %v758_v44  ;;  %v2436_v28 = vmul.f32 0.5, %v758_v44 }
 0x282   : > { %3352 = vst [vmem:[#allocation11_spill] sm:$0xff] %v2376_v46  ;;  %v2381_v48 = vmul.f32 0.70710677, %v2376_v46 }
 0x283   : > { %v860_v53 = vand.u32 2147483647, %v2378_v47  ;;  %3362 = vst [vmem:[#allocation21_spill] sm:$0xff] %v2436_v28 }
 0x284   : > { %3353 = vst [vmem:[#allocation12_spill] sm:$0xff] %v2381_v48  ;;  %v728_v49 = vpop.f32.mrf.mxu3  ;;  %v862_v54 = vand.u32 2147483647, %v2381_v48 }
 0x285   : > { %v729_v50 = vadd.f32 %v728_v49, %v681_v42  ;;  %v786_v51 = vpop.f32.mrf.mxu2  ;;  %v876_v57 = vmul.f32 0.3275911, %v860_v53  ;;  %v1292_v6 = vsub.f32 0.0, %v860_v53 }
 0x286   : > { %v2383_v52 = vadd.f32 %v786_v51, %v681_v42  ;;  %v878_v58 = vmul.f32 0.3275911, %v862_v54  ;;  %v760_v61 = vpop.f32.mrf.mxu1  ;;  %v1294_v21 = vsub.f32 0.0, %v862_v54 }
 0x287   : > { %v2387_v55 = vmul.f32 0.70710677, %v729_v50  ;;  %v2394_v62 = vadd.f32 1.0, %v876_v57  ;;  %v818_v63 = vpop.f32.mrf.mxu0  ;;  %v2398_v2 = vadd.f32 %v760_v61, %v686_v41  ;;  %v1308_v14 = vmul.f32 %v1292_v6, %v860_v53 }
 0x288   : > { %3354 = vst [vmem:[#allocation13_spill] sm:$0xff] %v2383_v52  ;;  %v2390_v56 = vmul.f32 0.70710677, %v2383_v52  ;;  %v2396_v0 = vadd.f32 1.0, %v878_v58  ;;  %v2400_v4 = vadd.f32 %v818_v63, %v686_v41  ;;  %v2440_v30 = vmul.f32 0.5, %v729_v50 }
 0x289   : > { %3355 = vst [vmem:[#allocation14_spill] sm:$0xff] %v2387_v55  ;;  %v859_v59 = vand.u32 2147483647, %v2387_v55  ;;  %1910 = vrcp.f32 %v2394_v62  ;;  %v2409_v9 = vmul.f32 0.70710677, %v2398_v2  ;;  %v933_v20 = vand.u32 2147483648, %v2394_v62 }
 0x28a   : > { %3356 = vst [vmem:[#allocation15_spill] sm:$0xff] %v2390_v56  ;;  %v861_v60 = vand.u32 2147483647, %v2390_v56  ;;  %1912 = vrcp.f32 %v2396_v0  ;;  %v2416_v13 = vmul.f32 0.70710677, %v2400_v4  ;;  %v963_v25 = vand.u32 2147483648, %v2396_v0 }
 0x28b   : > { %3357 = vst [vmem:[#allocation16_spill] sm:$0xff] %v2396_v0  ;;  %v875_v1 = vmul.f32 0.3275911, %v859_v59  ;;  %v1291_v11 = vsub.f32 0.0, %v859_v59  ;;  %v2419_v15 = vand.u32 2147483647, %v2409_v9  ;;  %v2456_v39 = vmul.f32 %v1294_v21, %v862_v54 }
 0x28c   : > { %v877_v3 = vmul.f32 0.3275911, %v861_v60  ;;  %3358 = vst [vmem:[#allocation17_spill] sm:$0xff] %v2400_v4  ;;  %v731_v5 = vpop.f32.mrf.mxu3  ;;  %v2423_v16 = vand.u32 2147483647, %v2416_v13  ;;  %v1293_v26 = vsub.f32 0.0, %v861_v60  ;;  %vm927_vm10 = vweird.f32 %v2394_v62 }
 0x28d   : > { %v2404_v7 = vadd.f32 1.0, %v875_v1  ;;  %v2411_v10 = vadd.f32 %v731_v5, %v686_v41  ;;  %3359 = vst [vmem:[#allocation18_spill] sm:$0xff] %v2416_v13  ;;  %v1307_v22 = vmul.f32 %v1291_v11, %v859_v59  ;;  %v789_v23 = vpop.f32.mrf.mxu2  ;;  %v1325_v24 = vmul.f32 1.442695, %v1308_v14 }
 0x28e   : > { %v2413_v12 = vadd.f32 1.0, %v877_v3  ;;  %v880_v27 = vmul.f32 0.3275911, %v2419_v15  ;;  %3363 = vst [vmem:[#allocation22_spill] sm:$0xff] %v2440_v30  ;;  %v882_v31 = vmul.f32 0.3275911, %v2423_v16  ;;  %v2449_v35 = vadd.f32 %v789_v23, %v686_v41  ;;  %v763_v49 = vpop.f32.mrf.mxu1 }
 0x28f   : > { %1914 = vrcp.f32 %v2404_v7  ;;  %v2425_v17 = vpop.eup %1910  ;;  %v2428_v18 = vmul.f32 0.70710677, %v2411_v10  ;;  %v2453_v37 = vor.u32 1.1754944e-38, %v933_v20  ;;  %3364 = vst [vmem:[#allocation23_spill] sm:$0xff] %v2456_v39  ;;  %v1323_v40 = vmul.f32 1.442695, %v1307_v22 }
 0x290   : > { %v2430_v19 = vpop.eup %1912  ;;  %1916 = vrcp.f32 %v2413_v12  ;;  %v923_v29 = vmul.f32 %v2425_v17, %v2394_v62  ;;  %v2458_v42 = vor.u32 1.1754944e-38, %v963_v25  ;;  %v1309_v43 = vmul.f32 %v1293_v26, %v861_v60  ;;  %v821_v26 = vpop.f32.mrf.mxu0 }
 0x291   : > { %3360 = vst [vmem:[#allocation19_spill] sm:$0xff] %v2428_v18  ;;  %v953_v33 = vmul.f32 %v2430_v19, %v2396_v0  ;;  %v2447_v34 = vand.u32 2147483647, %v2428_v18  ;;  %1918 = vpow2.f32 %v1325_v24  ;;  %v2460_v44 = vadd.f32 1.0, %v880_v27 }
 0x292   : > { %3361 = vst [vmem:[#allocation20_spill] sm:$0xff] %v2430_v19  ;;  %v924_v41 = vsub.f32 1.0, %v923_v29  ;;  %v918_v53 = vand.u32 2147483648, %v2404_v7  ;;  %v2466_v57 = vadd.f32 1.0, %v882_v31  ;;  %v2472_v60 = vmul.f32 0.70710677, %v2449_v35 }
 0x293   : > { %3365 = vst [vmem:[#allocation24_spill] sm:$0xff] %v2458_v42  ;;  %v954_v54 = vsub.f32 1.0, %v953_v33  ;;  %v879_v59 = vmul.f32 0.3275911, %v2447_v34  ;;  %1920 = vpow2.f32 %v1323_v40  ;;  %v948_v61 = vand.u32 2147483648, %v2413_v12 }
 0x294   : > { %3366 = vst [vmem:[#allocation25_spill] sm:$0xff] %v2466_v57  ;;  %v1296_v63 = vsub.f32 0.0, %v2419_v15  ;;  %v2476_v1 = vadd.f32 %v763_v49, %v691_v45  ;;  %v1327_v5 = vmul.f32 1.442695, %v1309_v43  ;;  %1922 = vrcp.f32 %v2460_v44  ;;  %v734_v40 = vpop.f32.mrf.mxu3 }
 0x295   : > { %v2451_v36 = vpop.eup %1914  ;;  %3367 = vst [vmem:[#allocation26_spill] sm:$0xff] %v2472_v60  ;;  %v865_v6 = vand.u32 2147483647, %v2472_v60  ;;  %v2483_v11 = vmul.f32 %v2425_v17, %v924_v41  ;;  %v2485_v14 = vor.u32 1.1754944e-38, %v918_v53  ;;  %1924 = vrcp.f32 %v2466_v57  ;;  %v792_v53 = vpop.f32.mrf.mxu2 }
 0x296   : > { %v2462_v50 = vpop.eup %1916  ;;  %v908_v58 = vmul.f32 %v2451_v36, %v2404_v7  ;;  %v2492_v22 = vmul.f32 %v2430_v19, %v954_v54  ;;  %v2494_v24 = vadd.f32 1.0, %v879_v59  ;;  %v2496_v27 = vor.u32 1.1754944e-38, %v948_v61  ;;  %v766_v60 = vpop.f32.mrf.mxu1 }
 0x297   : > { %v938_v3 = vmul.f32 %v2462_v50, %v2413_v12  ;;  %3368 = vst [vmem:[#allocation27_spill] sm:$0xff] %v2485_v14  ;;  %v2489_v21 = vpop.eup %1918  ;;  %v881_v25 = vmul.f32 0.3275911, %v865_v6  ;;  %v2499_v29 = vmul.f32 0.5, %v2398_v2  ;;  %v1312_v31 = vmul.f32 %v1296_v63, %v2419_v15 }
 0x298   : > { %3369 = vst [vmem:[#allocation28_spill] sm:$0xff] %v2492_v22  ;;  %v909_v23 = vsub.f32 1.0, %v908_v58  ;;  %v2503_v33 = vmul.f32 0.70710677, %v2476_v1  ;;  %1926 = vpow2.f32 %v1327_v5  ;;  %v993_v49 = vand.u32 2147483648, %v2460_v44 }
 0x299   : > { %3370 = vst [vmem:[#allocation29_spill] sm:$0xff] %v2496_v27  ;;  %v939_v43 = vsub.f32 1.0, %v938_v3  ;;  %v1298_v41 = vsub.f32 0.0, %v2423_v16  ;;  %v2507_v54 = vpop.eup %1920  ;;  %v1295_v58 = vsub.f32 0.0, %v2447_v34  ;;  %v2510_v59 = vadd.f32 1.0, %v881_v25 }
 0x29a   : > { %3371 = vst [vmem:[#allocation30_spill] sm:$0xff] %v2499_v29  ;;  %v868_v2 = vand.u32 2147483647, %v2503_v33  ;;  %v2513_v15 = vadd.f32 %v821_v26, %v691_v45  ;;  %v2515_v61 = vpop.eup %1922  ;;  %v2518_v63 = vmul.f32 %v2451_v36, %v909_v23  ;;  %v2521_v3 = vmul.f32 0.5, %v2411_v10 }
 0x29b   : > { %3372 = vst [vmem:[#allocation31_spill] sm:$0xff] %v2507_v54  ;;  %1928 = vrcp.f32 %v2494_v24  ;;  %v2524_v5 = vadd.f32 %v734_v40, %v691_v45  ;;  %v2526_v38 = vpop.eup %1924  ;;  %v1333_v20 = vmul.f32 1.442695, %v1312_v31  ;;  %v1297_v51 = vsub.f32 0.0, %v865_v6 }
 0x29c   : > { %3373 = vst [vmem:[#allocation32_spill] sm:$0xff] %v2513_v15  ;;  %v2529_v26 = vadd.f32 %v792_v53, %v691_v45  ;;  %v2532_v32 = vmul.f32 %v2462_v50, %v939_v43  ;;  %v2534_v23 = vor.u32 1.1754944e-38, %v993_v49  ;;  %v1023_v10 = vand.u32 2147483648, %v2466_v57 }
 0x29d   : > { %3374 = vst [vmem:[#allocation33_spill] sm:$0xff] %v2518_v63  ;;  %v884_v46 = vmul.f32 0.3275911, %v868_v2  ;;  %v1314_v48 = vmul.f32 %v1298_v41, %v2423_v16  ;;  %v1311_v40 = vmul.f32 %v1295_v58, %v2447_v34  ;;  %1930 = vrcp.f32 %v2510_v59 }
 0x29e   : > { %3375 = vst [vmem:[#allocation34_spill] sm:$0xff] %v2521_v3  ;;  %v2541_v25 = vmul.f32 0.70710677, %v2513_v15  ;;  %v2543_v31 = vpop.eup %1926  ;;  %v983_v45 = vmul.f32 %v2515_v61, %v2460_v44  ;;  %v1013_v43 = vmul.f32 %v2526_v38, %v2466_v57  ;;  %v2552_v53 = vmul.f32 0.70710677, %v2524_v5 }
 0x29f   : > { %3376 = vst [vmem:[#allocation35_spill] sm:$0xff] %v2526_v38  ;;  %v2549_v49 = vadd.f32 1.0, %v884_v46  ;;  %1932 = vpow2.f32 %v1333_v20  ;;  %v1313_v16 = vmul.f32 %v1297_v51, %v865_v6  ;;  %v2556_v41 = vmul.f32 0.70710677, %v2529_v26 }
 0x2a0   : > { %3377 = vst [vmem:[#allocation36_spill] sm:$0xff] %v2532_v32  ;;  %v870_v34 = vand.u32 2147483647, %v2541_v25  ;;  %v2561_v13 = vor.u32 1.1754944e-38, %v1023_v10  ;;  %v2564_v15 = vmul.f32 0.5, %v2449_v35  ;;  %v978_v46 = vand.u32 2147483648, %v2494_v24 }
 0x2a1   : > { %3378 = vst [vmem:[#allocation37_spill] sm:$0xff] %v2541_v25  ;;  %v2558_v58 = vpop.eup %1928  ;;  %1934 = vrcp.f32 %v2549_v49  ;;  %v1331_v20 = vmul.f32 1.442695, %v1311_v40  ;;  %v1300_v51 = vsub.f32 0.0, %v868_v2  ;;  %v984_v25 = vsub.f32 1.0, %v983_v45 }
 0x2a2   : > { %3379 = vst [vmem:[#allocation38_spill] sm:$0xff] %v2543_v31  ;;  %v886_v6 = vmul.f32 0.3275911, %v870_v34  ;;  %v1014_v30 = vsub.f32 1.0, %v1013_v43  ;;  %v2568_v52 = vmul.f32 1.442695, %v1314_v48  ;;  %v968_v10 = vmul.f32 %v2558_v58, %v2494_v24 }
 0x2a3   : > { %3380 = vst [vmem:[#allocation39_spill] sm:$0xff] %v2552_v53  ;;  %v867_v56 = vand.u32 2147483647, %v2552_v53  ;;  %v2571_v39 = vpop.eup %1930  ;;  %v1335_v4 = vmul.f32 1.442695, %v1313_v16  ;;  %v1008_v40 = vand.u32 2147483648, %v2510_v59  ;;  %1936 = vpow2.f32 %v1331_v20 }
 0x2a4   : > { %3381 = vst [vmem:[#allocation40_spill] sm:$0xff] %v2556_v41  ;;  %v2578_v3 = vadd.f32 1.0, %v886_v6  ;;  %v1302_v45 = vsub.f32 0.0, %v870_v34  ;;  %v2585_v31 = vmul.f32 0.5, %v2476_v1  ;;  %v1316_v54 = vmul.f32 %v1300_v51, %v868_v2  ;;  %v824_v2 = vpop.f32.mrf.mxu0 }
 0x2a5   : > { %3382 = vst [vmem:[#allocation41_spill] sm:$0xff] %v2561_v13  ;;  %v883_v43 = vmul.f32 0.3275911, %v867_v56  ;;  %v2580_v48 = vpop.eup %1932  ;;  %v2590_v16 = vmul.f32 %v2515_v61, %v984_v25  ;;  %v2593_v35 = vmul.f32 %v2526_v38, %v1014_v30  ;;  %v998_v6 = vmul.f32 %v2571_v39, %v2510_v59  ;;  %v737_v30 = vpop.f32.mrf.mxu3 }
 0x2a6   : > { %3383 = vst [vmem:[#allocation42_spill] sm:$0xff] %v2564_v15  ;;  %v869_v15 = vand.u32 2147483647, %v2556_v41  ;;  %1938 = vpow2.f32 %v1335_v4  ;;  %v2600_v51 = vor.u32 1.1754944e-38, %v1008_v40  ;;  %v1318_v25 = vmul.f32 %v1302_v45, %v870_v34 }
 0x2a7   : > { %3384 = vst [vmem:[#allocation43_spill] sm:$0xff] %v2568_v52  ;;  %v2582_v52 = vor.u32 1.1754944e-38, %v978_v46  ;;  %v2587_v42 = vpop.eup %1934  ;;  %v2597_v55 = vadd.f32 1.0, %v883_v43  ;;  %v969_v46 = vsub.f32 1.0, %v968_v10  ;;  %1940 = vrcp.f32 %v2578_v3 }
 0x2a8   : > { %3385 = vst [vmem:[#allocation44_spill] sm:$0xff] %v2578_v3  ;;  %v885_v1 = vmul.f32 0.3275911, %v869_v15  ;;  %v1299_v22 = vsub.f32 0.0, %v867_v56  ;;  %v1043_v13 = vmul.f32 %v2587_v42, %v2549_v49  ;;  %v1053_v43 = vand.u32 2147483648, %v2549_v49 }
 0x2a9   : > { %3386 = vst [vmem:[#allocation45_spill] sm:$0xff] %v2582_v52  ;;  %v1341_v18 = vmul.f32 1.442695, %v1316_v54  ;;  %1942 = vrcp.f32 %v2597_v55  ;;  %v999_v10 = vsub.f32 1.0, %v998_v6  ;;  %v767_v20 = vadd.f32 %v766_v60, %v2406_v8 }
 0x2aa   : > { %3387 = vst [vmem:[#allocation46_spill] sm:$0xff] %v2593_v35  ;;  %v2607_v4 = vadd.f32 1.0, %v885_v1  ;;  %v2611_v40 = vadd.f32 %v824_v2, %v2406_v8  ;;  %v2613_v35 = vpop.eup %1936  ;;  %v2616_v34 = vmul.f32 %v2558_v58, %v969_v46  ;;  %v1083_v45 = vand.u32 2147483648, %v2578_v3 }
 0x2ab   : > { %3388 = vst [vmem:[#allocation47_spill] sm:$0xff] %v2600_v51  ;;  %v2620_v41 = vmul.f32 0.5, %v2524_v5  ;;  %v2623_v54 = vadd.f32 %v737_v30, %v2406_v8  ;;  %v1345_v6 = vmul.f32 1.442695, %v1318_v25  ;;  %v1315_v1 = vmul.f32 %v1299_v22, %v867_v56 }
 0x2ac   : > { %3389 = vst [vmem:[#allocation48_spill] sm:$0xff] %v2611_v40  ;;  %1944 = vrcp.f32 %v2607_v4  ;;  %v1301_v60 = vsub.f32 0.0, %v869_v15  ;;  %v2626_v2 = vpop.eup %1938  ;;  %v1044_v27 = vsub.f32 1.0, %v1043_v13  ;;  %v2629_v46 = vor.u32 1.1754944e-38, %v1053_v43 }
 0x2ad   : > { %3390 = vst [vmem:[#allocation49_spill] sm:$0xff] %v2613_v35  ;;  %v2632_v14 = vmul.f32 0.5, %v2529_v26  ;;  %v2634_v5 = vpop.eup %1940  ;;  %v2637_v30 = vmul.f32 %v2571_v39, %v999_v10  ;;  %1946 = vpow2.f32 %v1341_v18  ;;  %v2639_v56 = vmul.f32 0.70710677, %v767_v20 }
 0x2ae   : > { %3391 = vst [vmem:[#allocation50_spill] sm:$0xff] %v2616_v34  ;;  %v2642_v22 = vmul.f32 0.70710677, %v2611_v40  ;;  %v2647_v43 = vor.u32 1.1754944e-38, %v1083_v45  ;;  %v1038_v26 = vand.u32 2147483648, %v2597_v55  ;;  %1948 = vpow2.f32 %v1345_v6 }
 0x2af   : > { %3392 = vst [vmem:[#allocation51_spill] sm:$0xff] %v2620_v41  ;;  %v2644_v25 = vpop.eup %1942  ;;  %v2651_v35 = vmul.f32 0.70710677, %v2623_v54  ;;  %v1339_v10 = vmul.f32 1.442695, %v1315_v1  ;;  %vm1047_vm6 = vweird.f32 %v2549_v49  ;;  %vm1048_vm7 = vweird.f32 %v2587_v42 }
 0x2b0   : > { %3393 = vst [vmem:[#allocation52_spill] sm:$0xff] %v2626_v2  ;;  %v872_v18 = vand.u32 2147483647, %v2639_v56  ;;  %v1045_v2 = vmul.f32 %v2587_v42, %v1044_v27  ;;  %v874_v41 = vand.u32 2147483647, %v2642_v22  ;;  %v1028_v6 = vmul.f32 %v2644_v25, %v2597_v55  ;;  %vm1049_vm15 = vmor %vm1047_vm6, %vm1048_vm7 }
 0x2b1   : > { %3394 = vst [vmem:[#allocation53_spill] sm:$0xff] %v2632_v14  ;;  %v1317_v14 = vmul.f32 %v1301_v60, %v869_v15  ;;  %v871_v13 = vand.u32 2147483647, %v2651_v35  ;;  %v2666_v27 = vor.u32 1.1754944e-38, %v1038_v26  ;;  %v1068_v40 = vand.u32 2147483648, %v2607_v4 }
 0x2b2   : > { %3395 = vst [vmem:[#allocation54_spill] sm:$0xff] %v2634_v5  ;;  %v2658_v45 = vpop.eup %1944  ;;  %v888_v1 = vmul.f32 0.3275911, %v872_v18  ;;  %v1304_v15 = vsub.f32 0.0, %v872_v18  ;;  %1950 = vpow2.f32 %v1339_v10  ;;  %v1306_v63 = vsub.f32 0.0, %v874_v41 }
 0x2b3   : > { %3396 = vst [vmem:[#allocation55_spill] sm:$0xff] %v2637_v30  ;;  %v1058_v60 = vmul.f32 %v2658_v45, %v2607_v4  ;;  %v2671_v19 = vpop.eup %1946  ;;  %v1343_v0 = vmul.f32 1.442695, %v1317_v14  ;;  %v887_v26 = vmul.f32 0.3275911, %v871_v13  ;;  %v1029_v52 = vsub.f32 1.0, %v1028_v6 }
 0x2b4   : > { %3397 = vst [vmem:[#allocation56_spill] sm:$0xff] %v2642_v22  ;;  %v890_v22 = vmul.f32 0.3275911, %v874_v41  ;;  %v2673_v32 = vadd.f32 1.0, %v888_v1  ;;  %v1320_v28 = vmul.f32 %v1304_v15, %v872_v18  ;;  %v2678_v38 = vpop.eup %1948  ;;  %v2680_v30 = vmul.f32 0.5, %v767_v20  ;;  %v795_v1 = vpop.f32.mrf.mxu2 }
 0x2b5   : > { %3398 = vst [vmem:[#allocation57_spill] sm:$0xff] %v2647_v43  ;;  %v1073_v43 = vmul.f32 %v2634_v5, %v2578_v3  ;;  %v1059_v3 = vsub.f32 1.0, %v1058_v60  ;;  %v2683_v10 = vor.u32 1.1754944e-38, %v1068_v40  ;;  %v1303_v14 = vsub.f32 0.0, %v871_v13 }
 0x2b6   : > { %v2676_v53 = vadd.f32 1.0, %v890_v22  ;;  %3399 = vst [vmem:[#allocation58_spill] sm:$0xff] %v2678_v38  ;;  %1952 = vrcp.f32 %v2673_v32  ;;  %vm987_vm8 = vweird.f32 %v2460_v44  ;;  %vm988_vm9 = vweird.f32 %v2515_v61 }
 0x2b7   : > { %v1074_v57 = vsub.f32 1.0, %v1073_v43  ;;  %3400 = vst [vmem:[#allocation59_spill] sm:$0xff] %v2683_v10  ;;  %v1111_v22 = vand.u32 2147483647, %v2673_v32  ;;  %v1322_v43 = vmul.f32 %v1306_v63, %v874_v41  ;;  %v2690_v20 = vmul.f32 0.5, %v2623_v54  ;;  %vm2755_vm6 = vmor %vm987_vm8, %vm988_vm9 }
 0x2b8   : > { %1954 = vrcp.f32 %v2676_v53  ;;  %v1113_v18 = vand.u32 2147483648, %v2673_v32  ;;  %v1349_v6 = vmul.f32 1.442695, %v1320_v28  ;;  %v1143_v40 = vand.u32 2147483648, %v2676_v53  ;;  %v2696_v60 = vpop.eup %1950 }
 0x2b9   : > { %1956 = vpow2.f32 %v1343_v0  ;;  %3401 = vst [vmem:[#allocation60_spill] sm:$0xff] %v2690_v20  ;;  %v2694_v15 = vadd.f32 1.0, %v887_v26  ;;  %v2699_v51 = vmul.f32 %v2634_v5, %v1074_v57  ;;  %v2702_v0 = vmul.f32 %v2644_v25, %v1029_v52 }
 0x2ba   : > { %3402 = vst [vmem:[#allocation61_spill] sm:$0xff] %v2696_v60  ;;  %v1141_v63 = vand.u32 2147483647, %v2676_v53  ;;  %v2706_v41 = vadd.f32 %v795_v1, %v2406_v8  ;;  %vm928_vm11 = vweird.f32 %v2425_v17  ;;  %v2711_v28 = vmul.f32 %v2658_v45, %v1059_v3 }
 0x2bb   : > { %3403 = vst [vmem:[#allocation62_spill] sm:$0xff] %v2699_v51  ;;  %vm1107_vm12 = vweird.f32 %v2673_v32  ;;  %v1319_v54 = vmul.f32 %v1303_v14, %v871_v13  ;;  %v1046_v57 = vadd.f32 %v2587_v42, %v1045_v2  ;;  %vm1137_vm13 = vweird.f32 %v2676_v53 }
 0x2bc   : > { %v1953_v26 = vpop.eup %1952  ;;  %v1353_v52 = vmul.f32 1.442695, %v1322_v43  ;;  %1958 = vrcp.f32 %v2694_v15  ;;  %v2718_v8 = vmul.f32 0.70710677, %v2706_v41  ;;  %vm2721_vm14 = vcmp.eq.f32.partialorder %v1111_v22, 8.507059e+37 }
 0x2bd   : > { %v1103_v38 = vmul.f32 %v1953_v26, %v2673_v32  ;;  %v1114_v51 = vor.u32 1.1754944e-38, %v1113_v18  ;;  %1960 = vpow2.f32 %v1349_v6  ;;  %v1144_v13 = vor.u32 1.1754944e-38, %v1143_v40 }
 0x2be   : > { %3404 = vst [vmem:[#allocation63_spill] sm:$0xff] %v2718_v8  ;;  %v1955_v1 = vpop.eup %1954  ;;  %vm2732_vm0 = vcmp.eq.f32.partialorder %v1141_v63, 8.507059e+37  ;;  %v1096_v22 = vand.u32 2147483647, %v2694_v15  ;;  %v1098_v60 = vand.u32 2147483648, %v2694_v15  ;;  %1962 = vpow2.f32 %v1353_v52 }
 0x2bf   : > { %v2725_v2 = vpop.eup %1956  ;;  %v1133_v14 = vmul.f32 %v1955_v1, %v2676_v53  ;;  %v873_v18 = vand.u32 2147483647, %v2718_v8  ;;  %v1104_v6 = vsub.f32 1.0, %v1103_v38  ;;  %v1347_v40 = vmul.f32 1.442695, %v1319_v54 }
 0x2c0   : > { %3407 = vst [vmem:[#allocation64_spill] sm:$0xff] %v2725_v2  ;;  %v1050_v2 = vsel %vm1049_vm15, %v2587_v42, %v1046_v57  ;;  %v3410_v20 = vand.u32 2147483647, %v2549_v49  ;;  %vm1108_vm2 = vweird.f32 %v1953_v26  ;;  %vm1092_vm3 = vweird.f32 %v2694_v15 }
 0x2c1   : > { %v1134_v5 = vsub.f32 1.0, %v1133_v14  ;;  %v889_v10 = vmul.f32 0.3275911, %v873_v18  ;;  %v1105_v29 = vmul.f32 %v1953_v26, %v1104_v6  ;;  %v1305_v34 = vsub.f32 0.0, %v873_v18  ;;  %vm1109_vm15 = vmor %vm1107_vm12, %vm1108_vm2 }
 0x2c2   : > { %vm1052_vm1 = vcmp.eq.f32.partialorder %v3410_v20, 8.507059e+37  ;;  %v1959_v38 = vpop.eup %1958  ;;  %vm1138_vm4 = vweird.f32 %v1955_v1  ;;  %v1099_v42 = vor.u32 1.1754944e-38, %v1098_v60  ;;  %vm2760_vm7 = vcmp.eq.f32.partialorder %v1096_v22, 8.507059e+37  ;;  %vm2789_vm12 = vmor %vm927_vm10, %vm928_vm11 }
 0x2c3   : > { %v2743_v63 = vsel %vm1052_vm1, %v2629_v46, %v1050_v2  ;;  %v1135_v54 = vmul.f32 %v1955_v1, %v1134_v5  ;;  %v2747_v57 = vadd.f32 1.0, %v889_v10  ;;  %v2749_v49 = vpop.eup %1960  ;;  %v1106_v20 = vadd.f32 %v1953_v26, %v1105_v29  ;;  %vm1139_vm9 = vmor %vm1137_vm13, %vm1138_vm4 }
 0x2c4   : > { %v1156_v8 = vmul.f32 1.0614054, %v2743_v63  ;;  %v1088_v52 = vmul.f32 %v1959_v38, %v2694_v15  ;;  %1964 = vpow2.f32 %v1347_v40  ;;  %v986_v60 = vadd.f32 %v2515_v61, %v2590_v16  ;;  %v2783_v40 = vpop.eup %1962 }
 0x2c5   : > { %v1136_v10 = vadd.f32 %v1955_v1, %v1135_v54  ;;  %1966 = vrcp.f32 %v2747_v57  ;;  %v3415_v29 = vand.u32 2147483647, %v2460_v44  ;;  %v1110_v22 = vsel %vm1109_vm15, %v1953_v26, %v1106_v20 }
 0x2c6   : > { %v1172_v5 = vadd.f32 -1.4531521, %v1156_v8  ;;  %v1089_v8 = vsub.f32 1.0, %v1088_v52  ;;  %v2779_v32 = vmul.f32 %v1305_v34, %v873_v18  ;;  %v926_v6 = vadd.f32 %v2425_v17, %v2483_v11 }
 0x2c7   : > { %vm2772_vm8 = vcmp.eq.f32.partialorder %v3415_v29, 8.507059e+37  ;;  %vm1033_vm1 = vweird.f32 %v2644_v25  ;;  %v2796_v53 = vsel %vm2721_vm14, %v1114_v51, %v1110_v22  ;;  %v1140_v16 = vsel %vm1139_vm9, %v1955_v1, %v1136_v10 }
 0x2c8   : > { %vm1093_vm13 = vweird.f32 %v1959_v38  ;;  %v1188_v11 = vmul.f32 %v1172_v5, %v2743_v63  ;;  %v1160_v34 = vmul.f32 1.0614054, %v2796_v53  ;;  %v2802_v26 = vsel %vm2732_vm0, %v1144_v13, %v1140_v16 }
 0x2c9   : > { %v1090_v18 = vmul.f32 %v1959_v38, %v1089_v8  ;;  %v1126_v54 = vand.u32 2147483647, %v2747_v57  ;;  %vm1032_vm10 = vweird.f32 %v2597_v55  ;;  %v1162_v20 = vmul.f32 1.0614054, %v2802_v26  ;;  %vm1094_vm14 = vmor %vm1092_vm3, %vm1093_vm13 }
 0x2ca   : > { %v1128_v51 = vand.u32 2147483648, %v2747_v57  ;;  %v1204_v3 = vadd.f32 1.4214138, %v1188_v11  ;;  %v990_v1 = vsel %vm2755_vm6, %v2515_v61, %v986_v60  ;;  %v2811_v52 = vpop.eup %1964  ;;  %v1176_v5 = vadd.f32 -1.4531521, %v1160_v34  ;;  %vm2856_vm6 = vmor %vm1032_vm10, %vm1033_vm1 }
 0x2cb   : > { %v1091_v43 = vadd.f32 %v1959_v38, %v1090_v18  ;;  %vm1122_vm11 = vweird.f32 %v2747_v57  ;;  %v2817_v13 = vsel %vm2772_vm8, %v2534_v23, %v990_v1  ;;  %v930_v10 = vsel %vm2789_vm12, %v2425_v17, %v926_v6  ;;  %v1967_v29 = vpop.eup %1966 }
 0x2cc   : > { %v1178_v22 = vadd.f32 -1.4531521, %v1162_v20  ;;  %v1220_v61 = vmul.f32 %v1204_v3, %v2743_v63  ;;  %v1152_v46 = vmul.f32 1.0614054, %v2817_v13  ;;  %v3420_v60 = vand.u32 2147483647, %v2394_v62 }
 0x2cd   : > { %v1192_v23 = vmul.f32 %v1176_v5, %v2796_v53  ;;  %v1095_v14 = vsel %vm1094_vm14, %v1959_v38, %v1091_v43  ;;  %v1118_v8 = vmul.f32 %v1967_v29, %v2747_v57  ;;  %vm1123_vm2 = vweird.f32 %v1967_v29 }
 0x2ce   : > { %vm932_vm0 = vcmp.eq.f32.partialorder %v3420_v60, 8.507059e+37  ;;  %vm2831_vm4 = vcmp.eq.f32.partialorder %v1126_v54, 8.507059e+37  ;;  %v1194_v15 = vmul.f32 %v1178_v22, %v2802_v26  ;;  %v2838_v6 = vsel %vm2760_vm7, %v1099_v42, %v1095_v14  ;;  %vm1124_vm7 = vmor %vm1122_vm11, %vm1123_vm2 }
 0x2cf   : > { %v1236_v44 = vadd.f32 -0.28449672, %v1220_v61  ;;  %v1168_v16 = vadd.f32 -1.4531521, %v1152_v46  ;;  %v1208_v62 = vadd.f32 1.4214138, %v1192_v23  ;;  %v2842_v38 = vsel %vm932_vm0, %v2453_v37, %v930_v10 }
 0x2d0   : > { %v1159_v11 = vmul.f32 1.0614054, %v2838_v6  ;;  %v1119_v34 = vsub.f32 1.0, %v1118_v8  ;;  %v1210_v18 = vadd.f32 1.4214138, %v1194_v15  ;;  %v1031_v5 = vadd.f32 %v2644_v25, %v2702_v0 }
 0x2d1   : > { %v1252_v54 = vmul.f32 %v1236_v44, %v2743_v63  ;;  %v1184_v20 = vmul.f32 %v1168_v16, %v2817_v13  ;;  %v1148_v3 = vmul.f32 1.0614054, %v2842_v38  ;;  %v1224_v2 = vmul.f32 %v1208_v62, %v2796_v53 }
 0x2d2   : > { %v1175_v42 = vadd.f32 -1.4531521, %v1159_v11  ;;  %v1120_v1 = vmul.f32 %v1967_v29, %v1119_v34  ;;  %v1226_v43 = vmul.f32 %v1210_v18, %v2802_v26  ;;  %vm1396_vm3 = vcmp.lt.f32.partialorder %v2503_v33, 0.0 }
 0x2d3   : > { %v1268_v22 = vadd.f32 0.2548296, %v1252_v54  ;;  %v1200_v61 = vadd.f32 1.4214138, %v1184_v20  ;;  %v1164_v37 = vadd.f32 -1.4531521, %v1148_v3  ;;  %v1035_v34 = vsel %vm2856_vm6, %v2644_v25, %v1031_v5 }
 0x2d4   : > { %v1240_v46 = vadd.f32 -0.28449672, %v1224_v2  ;;  %v1191_v60 = vmul.f32 %v1175_v42, %v2838_v6  ;;  %v1121_v23 = vadd.f32 %v1967_v29, %v1120_v1  ;;  %v1129_v0 = vor.u32 1.1754944e-38, %v1128_v51 }
 0x2d5   : > { %v1242_v14 = vadd.f32 -0.28449672, %v1226_v43  ;;  %v1284_v8 = vmul.f32 %v1268_v22, %v2743_v63  ;;  %v1216_v15 = vmul.f32 %v1200_v61, %v2817_v13  ;;  %v1180_v44 = vmul.f32 %v1164_v37, %v2842_v38 }
 0x2d6   : > { %v1256_v16 = vmul.f32 %v1240_v46, %v2796_v53  ;;  %v1207_v62 = vadd.f32 1.4214138, %v1191_v60  ;;  %v1125_v11 = vsel %vm1124_vm7, %v1967_v29, %v1121_v23  ;;  %vm1063_vm15 = vweird.f32 %v2658_v45 }
 0x2d7   : > { %v1258_v51 = vmul.f32 %v1242_v14, %v2802_v26  ;;  %v2874_v57 = vsel %vm2831_vm4, %v1129_v0, %v1125_v11  ;;  %v1364_v63 = vmul.f32 %v2671_v19, %v1284_v8  ;;  %v1232_v18 = vadd.f32 -0.28449672, %v1216_v15 }
 0x2d8   : > { %v1272_v54 = vadd.f32 0.2548296, %v1256_v16  ;;  %v1223_v20 = vmul.f32 %v1207_v62, %v2838_v6  ;;  %v1161_v3 = vmul.f32 1.0614054, %v2874_v57  ;;  %v1196_v2 = vadd.f32 1.4214138, %v1180_v44 }
 0x2d9   : > { %vm1400_vm8 = vcmp.lt.f32.partialorder %v2639_v56, 0.0  ;;  %v1274_v25 = vadd.f32 0.2548296, %v1258_v51  ;;  %v1380_v29 = vsub.f32 1.0, %v1364_v63  ;;  %v1248_v42 = vmul.f32 %v1232_v18, %v2817_v13  ;;  %v3445_v56 = vld [vmem:[#allocation35_spill] sm:$0xff] }
 0x2da   : > { %v3425_v17 = vand.u32 2147483647, %v2597_v55  ;;  %v1288_v19 = vmul.f32 %v1272_v54, %v2796_v53  ;;  %v1239_v1 = vadd.f32 -0.28449672, %v1223_v20  ;;  %v1177_v5 = vadd.f32 -1.4531521, %v1161_v3 }
 0x2db   : > { %v1212_v43 = vmul.f32 %v1196_v2, %v2842_v38  ;;  %vm1062_vm12 = vweird.f32 %v2607_v4  ;;  %v1290_v22 = vmul.f32 %v1274_v25, %v2802_v26  ;;  %v1412_v61 = vsub.f32 0.0, %v1380_v29 }
 0x2dc   : > { %vm1037_vm9 = vcmp.eq.f32.partialorder %v3425_v17, 8.507059e+37  ;;  %v1264_v37 = vadd.f32 0.2548296, %v1248_v42  ;;  %vm1392_vm1 = vcmp.lt.f32.partialorder %v2409_v9, 0.0  ;;  %v1368_v55 = vmul.f32 %v2749_v49, %v1288_v19 }
 0x2dd   : > { %v2889_v10 = vsel %vm1037_vm9, %v2666_v27, %v1035_v34  ;;  %v1255_v46 = vmul.f32 %v1239_v1, %v2838_v6  ;;  %v1193_v53 = vmul.f32 %v1177_v5, %v2874_v57  ;;  %v1228_v60 = vadd.f32 -0.28449672, %v1212_v43  ;;  %v3428_v5 = vld [vmem:[#allocation63_spill] sm:$0xff] }
 0x2de   : > { %v2896_v23 = vmul.f32 %v2783_v40, %v1290_v22  ;;  %v1428_v26 = vsel %vm1396_vm3, %v1412_v61, %v1380_v29  ;;  %v1280_v0 = vmul.f32 %v1264_v37, %v2817_v13  ;;  %v1155_v27 = vmul.f32 1.0614054, %v2889_v10  ;;  %vm2929_vm3 = vmor %vm1062_vm12, %vm1063_vm15  ;;  %v3430_v22 = vld [vmem:[#allocation50_spill] sm:$0xff] }
 0x2df   : > { %vm973_vm13 = vweird.f32 %v2558_v58  ;;  %v1384_v14 = vsub.f32 1.0, %v1368_v55  ;;  %v1271_v8 = vadd.f32 0.2548296, %v1255_v46  ;;  %v2904_v49 = vmul.f32 0.5, %v2706_v41  ;;  %v3431_v46 = vld [vmem:[#allocation30_spill] sm:$0xff] }
 0x2e0   : > { %v1209_v15 = vadd.f32 1.4214138, %v1193_v53  ;;  %vm1399_vm10 = vcmp.lt.f32.partialorder %v2651_v35, 0.0  ;;  %v1351_v40 = vmul.f32 1.442695, %v2779_v32  ;;  %v1360_v44 = vmul.f32 %v2580_v48, %v1280_v0 }
 0x2e1   : > { %v1244_v33 = vmul.f32 %v1228_v60, %v2842_v38  ;;  %v1171_v16 = vadd.f32 -1.4531521, %v1155_v27  ;;  %vm972_vm11 = vweird.f32 %v2494_v24  ;;  %vm1002_vm14 = vweird.f32 %v2510_v59  ;;  %v3432_v60 = vld [vmem:[#allocation59_spill] sm:$0xff] }
 0x2e2   : > { %vm1003_vm0 = vweird.f32 %v2571_v39  ;;  %v1416_v13 = vsub.f32 0.0, %v1384_v14  ;;  %v1287_v41 = vmul.f32 %v1271_v8, %v2838_v6  ;;  %v1225_v62 = vmul.f32 %v1209_v15, %v2874_v57  ;;  %v3435_v8 = vld [vmem:[#allocation44_spill] sm:$0xff]  ;;  %v3436_v15 = vld [vmem:[#allocation54_spill] sm:$0xff] }
 0x2e3   : > { %v1444_v11 = vadd.f32 1.0, %v1428_v26  ;;  %v1386_v34 = vsub.f32 1.0, %v2896_v23  ;;  %v1376_v32 = vsub.f32 1.0, %v1360_v44  ;;  %v1260_v51 = vadd.f32 0.2548296, %v1244_v33 }
 0x2e4   : > { %v1187_v48 = vmul.f32 %v1171_v16, %v2889_v10  ;;  %vm1388_vm2 = vcmp.lt.f32.partialorder %v2378_v47, 0.0  ;;  %v1432_v63 = vsel %vm1400_vm8, %v1416_v13, %v1384_v14  ;;  %v1367_v18 = vmul.f32 %v2811_v52, %v1287_v41  ;;  %v3438_v16 = vld [vmem:[#allocation55_spill] sm:$0xff]  ;;  %v3461_v41 = vld [vmem:[#allocation29_spill] sm:$0xff] }
 0x2e5   : > { %v1241_v54 = vadd.f32 -0.28449672, %v1225_v62  ;;  %v1061_v6 = vadd.f32 %v2658_v45, %v2711_v28  ;;  %v1448_v20 = vadd.f32 1.0, %v1432_v63  ;;  %1968 = vpow2.f32 %v1351_v40  ;;  %v3441_v62 = vld [vmem:[#allocation60_spill] sm:$0xff]  ;;  %v3442_v63 = vld [vmem:[#allocation45_spill] sm:$0xff] }
 0x2e6   : > { %v1408_v3 = vsub.f32 0.0, %v1376_v32  ;;  %v1276_v2 = vmul.f32 %v1260_v51, %v2842_v38  ;;  %vm913_vm4 = vweird.f32 %v2451_v36  ;;  %v1383_v52 = vsub.f32 1.0, %v1367_v18 }
 0x2e7   : > { %v1257_v25 = vmul.f32 %v1241_v54, %v2874_v57  ;;  %v1460_v28 = vmul.f32 %v1444_v11, %v2585_v31  ;;  %v1203_v29 = vadd.f32 1.4214138, %v1187_v48  ;;  %v1464_v42 = vmul.f32 %v1448_v20, %v2680_v30 }
 0x2e8   : > { %v1424_v38 = vsel %vm1392_vm1, %v1408_v3, %v1376_v32  ;;  %v1356_v17 = vmul.f32 %v2489_v21, %v1276_v2  ;;  %v1065_v19 = vsel %vm2929_vm3, %v2658_v45, %v1061_v6  ;;  %vm912_vm6 = vweird.f32 %v2404_v7  ;;  %vm2966_vm1 = vmor %vm972_vm11, %vm973_vm13  ;;  %v3444_v2 = vld [vmem:[#allocation25_spill] sm:$0xff] }
 0x2e9   : > { %vm942_vm7 = vweird.f32 %v2413_v12  ;;  %vm943_vm15 = vweird.f32 %v2462_v50  ;;  %v2947_v31 = vsub.f32 0.0, %v1386_v34  ;;  %v1415_v30 = vsub.f32 0.0, %v1383_v52  ;;  %1519 = vmatpush.msrb.mxu1 %v1464_v42  ;;  %vm2984_vm11 = vmor %vm1002_vm14, %vm1003_vm0  ;;  %v3448_v42 = vld [vmem:[#allocation47_spill] sm:$0xff] }
 0x2ea   : > { %v1273_v1 = vadd.f32 0.2548296, %v1257_v25  ;;  %v1440_v9 = vadd.f32 1.0, %v1424_v38  ;;  %vm1477_vm8 = vcmask 261120   ;;  %vm1401_vm9 = vcmp.lt.f32.partialorder %v3428_v5, 0.0 }
 0x2eb   : > { %v1372_v21 = vsub.f32 1.0, %v1356_v17  ;;  %v1219_v45 = vmul.f32 %v1203_v29, %v2889_v10  ;;  %v3429_v43 = vand.u32 2147483647, %v2607_v4  ;;  %v971_v61 = vadd.f32 %v2558_v58, %v3430_v22  ;;  %v1969_v0 = vpop.eup %1968  ;;  %1520 = vmatpush.msrb.mxu1 %v1460_v28  ;;  %v3447_v28 = vld [vmem:[#allocation21_spill] sm:$0xff]  ;;  %v3459_v4 = vld [vmem:[#allocation27_spill] sm:$0xff] }
 0x2ec   : > { %v1431_v37 = vsel %vm1399_vm10, %v1415_v30, %v1383_v52  ;;  %v1289_v55 = vmul.f32 %v1273_v1, %v2874_v57  ;;  %v1456_v53 = vmul.f32 %v1440_v9, %v3431_v46  ;;  %vm1077_vm10 = vweird.f32 %v3435_v8  ;;  %v3446_v52 = vld [vmem:[#allocation39_spill] sm:$0xff]  ;;  %v3449_v17 = vld [vmem:[#allocation33_spill] sm:$0xff] }
 0x2ed   : > { %vm1067_vm12 = vcmp.eq.f32.partialorder %v3429_v43, 8.507059e+37  ;;  %v1447_v27 = vadd.f32 1.0, %v1431_v37  ;;  %v1404_v35 = vsub.f32 0.0, %v1372_v21  ;;  %v1235_v14 = vadd.f32 -0.28449672, %v1219_v45 }
 0x2ee   : > { %v2960_v26 = vsel %vm1067_vm12, %v3432_v60, %v1065_v19  ;;  %vm1078_vm3 = vweird.f32 %v3436_v15  ;;  %v1369_v40 = vmul.f32 %v1969_v0, %v1289_v55  ;;  %v975_v44 = vsel %vm2966_vm1, %v2558_v58, %v971_v61  ;;  %1521 = vmatpush.msrb.mxu1 %v1456_v53  ;;  %vm3020_vm1 = vmor %vm912_vm6, %vm913_vm4  ;;  %v3453_v61 = vld [vmem:[#allocation36_spill] sm:$0xff]  ;;  %v3456_v55 = vld [vmem:[#allocation61_spill] sm:$0xff] }
 0x2ef   : > { %v1157_v57 = vmul.f32 1.0614054, %v2960_v26  ;;  %v3437_v33 = vand.u32 2147483647, %v2494_v24  ;;  %v1001_v13 = vadd.f32 %v2571_v39, %v3438_v16  ;;  %v1463_v11 = vmul.f32 %v1447_v27, %v3441_v62  ;;  %vm3039_vm6 = vmor %vm942_vm7, %vm943_vm15  ;;  %v3457_v53 = vld [vmem:[#allocation16_spill] sm:$0xff] }
 0x2f0   : > { %v1420_v58 = vsel %vm1388_vm2, %v1404_v35, %v1372_v21  ;;  %v1251_v24 = vmul.f32 %v1235_v14, %v2889_v10  ;;  %v1385_v51 = vsub.f32 1.0, %v1369_v40  ;;  %v3443_v3 = vand.u32 2147483647, %v2510_v59  ;;  %v3458_v60 = vld [vmem:[#allocation20_spill] sm:$0xff]  ;;  %vm3070_vm15 = vmor %vm1077_vm10, %vm1078_vm3 }
 0x2f1   : > { %vm977_vm13 = vcmp.eq.f32.partialorder %v3437_v33, 8.507059e+37  ;;  %v1173_v32 = vadd.f32 -1.4531521, %v1157_v57  ;;  %v1436_v48 = vadd.f32 1.0, %v1420_v58  ;;  %v1005_v54 = vsel %vm2984_vm11, %v2571_v39, %v1001_v13  ;;  %1496 = vmatpush.msrb.mxu0 %v1463_v11  ;;  %1844 = vmatpush.msrb.mxu3 %v1463_v11  ;;  %v3009_v39 = vld [vmem:[%s3304_s5] sm:$0xff]  ;;  %v3462_v11 = vld [vmem:[#allocation62_spill] sm:$0xff] }
 0x2f2   : > { %v2993_v18 = vsel %vm977_vm13, %v3442_v63, %v975_v44  ;;  %v1267_v6 = vadd.f32 0.2548296, %v1251_v24  ;;  %vm1007_vm14 = vcmp.eq.f32.partialorder %v3443_v3, 8.507059e+37  ;;  %vm1017_vm0 = vweird.f32 %v3444_v2 }
 0x2f3   : > { %v1189_v20 = vmul.f32 %v1173_v32, %v2960_v26  ;;  %v1151_v47 = vmul.f32 1.0614054, %v2993_v18  ;;  %vm1018_vm2 = vweird.f32 %v3445_v56  ;;  %vm1395_vm12 = vcmp.lt.f32.partialorder %v3446_v52, 0.0 }
 0x2f4   : > { %v1417_v25 = vsub.f32 0.0, %v1385_v51  ;;  %v1452_v29 = vmul.f32 %v1436_v48, %v3447_v28  ;;  %v3012_v38 = vsel %vm1007_vm14, %v3448_v42, %v1005_v54  ;;  %v911_v59 = vadd.f32 %v2451_v36, %v3449_v17  ;;  %vm3099_vm11 = vmor %vm1017_vm0, %vm1018_vm2 }
 0x2f5   : > { %v1283_v30 = vmul.f32 %v1267_v6, %v2889_v10  ;;  %v1205_v1 = vadd.f32 1.4214138, %v1189_v20  ;;  %v1167_v9 = vadd.f32 -1.4531521, %v1151_v47  ;;  %v1153_v21 = vmul.f32 1.0614054, %v3012_v38 }
 0x2f6   : > { %v1433_v45 = vsel %vm1401_vm9, %v1417_v25, %v1385_v51  ;;  %1522 = vmatpush.msrb.mxu1 %v1452_v29  ;;  %v915_v43 = vsel %vm3020_vm1, %v2451_v36, %v911_v59  ;;  %v3452_v22 = vand.u32 2147483647, %v2404_v7  ;;  %v941_v37 = vadd.f32 %v2462_v50, %v3453_v61  ;;  %v3466_v25 = vld [vmem:[#allocation40_spill] sm:$0xff] }
 0x2f7   : > { %v1449_v5 = vadd.f32 1.0, %v1433_v45  ;;  %1823 = vmatmul.msk.f32.vlgmr.msrb.gmra.mxu1 %vm1477_vm8, %v3009_v39  ;;  %v1363_v36 = vmul.f32 %v3456_v55, %v1283_v30  ;;  %v1221_v7 = vmul.f32 %v1205_v1, %v2960_v26  ;;  %v1183_v46 = vmul.f32 %v1167_v9, %v2993_v18  ;;  %v3470_v9 = vld [vmem:[#allocation51_spill] sm:$0xff] }
 0x2f8   : > { %vm917_vm4 = vcmp.eq.f32.partialorder %v3452_v22, 8.507059e+37  ;;  %vm957_vm9 = vweird.f32 %v3457_v53  ;;  %vm958_vm13 = vweird.f32 %v3458_v60  ;;  %v1169_v0 = vadd.f32 -1.4531521, %v1153_v21  ;;  %v3471_v22 = vld [vmem:[#allocation46_spill] sm:$0xff] }
 0x2f9   : > { %v3051_v27 = vsel %vm917_vm4, %v3459_v4, %v915_v43  ;;  %v945_v35 = vsel %vm3039_vm6, %v2462_v50, %v941_v37  ;;  %v3460_v14 = vand.u32 2147483647, %v2413_v12  ;;  %v1465_v57 = vmul.f32 %v1449_v5, %v2904_v49  ;;  %v3472_v37 = vld [vmem:[#allocation64_spill] sm:$0xff]  ;;  %vm3126_vm2 = vmor %vm957_vm9, %vm958_vm13 }
 0x2fa   : > { %v1379_v40 = vsub.f32 1.0, %v1363_v36  ;;  %v1237_v44 = vadd.f32 -0.28449672, %v1221_v7  ;;  %v1199_v33 = vadd.f32 1.4214138, %v1183_v46  ;;  %v1185_v16 = vmul.f32 %v1169_v0, %v3012_v38  ;;  %v3473_v36 = vld [vmem:[#allocation19_spill] sm:$0xff] }
 0x2fb   : > { %vm947_vm7 = vcmp.eq.f32.partialorder %v3460_v14, 8.507059e+37  ;;  %v1147_v13 = vmul.f32 1.0614054, %v3051_v27  ;;  %v1076_v58 = vadd.f32 %v3436_v15, %v3462_v11  ;;  %1542 = vmatpush.msrb.mxu2 %v1465_v57  ;;  %v3465_v54 = vand.u32 2147483647, %v3435_v8  ;;  %v3467_v8 = vld [vmem:[#allocation57_spill] sm:$0xff] }
 0x2fc   : > { %v3062_v62 = vsel %vm947_vm7, %v3461_v41, %v945_v35  ;;  %v1411_v50 = vsub.f32 0.0, %v1379_v40  ;;  %v1253_v49 = vmul.f32 %v1237_v44, %v2960_v26  ;;  %v1215_v24 = vmul.f32 %v1199_v33, %v2993_v18  ;;  %v3477_v33 = vld [vmem:[#allocation41_spill] sm:$0xff]  ;;  %v3479_v11 = vld [vmem:[#allocation26_spill] sm:$0xff] }
 0x2fd   : > { %v1149_v32 = vmul.f32 1.0614054, %v3062_v62  ;;  %v1201_v51 = vadd.f32 1.4214138, %v1185_v16  ;;  %v1163_v48 = vadd.f32 -1.4531521, %v1147_v13  ;;  %v1080_v63 = vsel %vm3070_vm15, %v3436_v15, %v1076_v58 }
 0x2fe   : > { %vm1082_vm10 = vcmp.eq.f32.partialorder %v3465_v54, 8.507059e+37  ;;  %v1427_v6 = vsel %vm1395_vm12, %v1411_v50, %v1379_v40  ;;  %v1269_v20 = vadd.f32 0.2548296, %v1253_v49  ;;  %v1231_v47 = vadd.f32 -0.28449672, %v1215_v24  ;;  %v3090_v15 = vld [vmem:[%s3304_s5 + $0x8] sm:$0xff] }
 0x2ff   : > { %v1165_v3 = vadd.f32 -1.4531521, %v1149_v32  ;;  %vm1397_vm3 = vcmp.lt.f32.partialorder %v3466_v25, 0.0  ;;  %v1443_v28 = vadd.f32 1.0, %v1427_v6  ;;  %v1217_v29 = vmul.f32 %v1201_v51, %v3012_v38  ;;  %1824 = vmatmul.msk.f32.gmra.mxu1 %vm1477_vm8, %v3090_v15  ;;  %v3478_v13 = vld [vmem:[#allocation28_spill] sm:$0xff]  ;;  %v3484_v25 = vld [vmem:[#allocation53_spill] sm:$0xff] }
 0x300   : > { %v1179_v42 = vmul.f32 %v1163_v48, %v3051_v27  ;;  %v3093_v17 = vsel %vm1082_vm10, %v3467_v8, %v1080_v63  ;;  %v1285_v59 = vmul.f32 %v1269_v20, %v2960_v26  ;;  %v1247_v19 = vmul.f32 %v1231_v47, %v2993_v18 }
 0x301   : > { %v1181_v30 = vmul.f32 %v1165_v3, %v3062_v62  ;;  %v1158_v1 = vmul.f32 1.0614054, %v3093_v17  ;;  %v1459_v21 = vmul.f32 %v1443_v28, %v3470_v9  ;;  %v1233_v45 = vadd.f32 -0.28449672, %v1217_v29  ;;  %v3481_v3 = vld [vmem:[#allocation52_spill] sm:$0xff] }
 0x302   : > { %v1195_v43 = vadd.f32 1.4214138, %v1179_v42  ;;  %v1016_v61 = vadd.f32 %v3445_v56, %v3471_v22  ;;  %v1365_v10 = vmul.f32 %v3472_v37, %v1285_v59  ;;  %v1263_v26 = vadd.f32 0.2548296, %v1247_v19  ;;  %v3482_v42 = vld [vmem:[#allocation14_spill] sm:$0xff] }
 0x303   : > { %v1197_v5 = vadd.f32 1.4214138, %v1181_v30  ;;  %v1174_v55 = vadd.f32 -1.4531521, %v1158_v1  ;;  %vm1391_vm14 = vcmp.lt.f32.partialorder %v3473_v36, 0.0  ;;  %1497 = vmatpush.msrb.mxu0 %v1459_v21  ;;  %1845 = vmatpush.msrb.mxu3 %v1459_v21  ;;  %v1249_v7 = vmul.f32 %v1233_v45, %v3012_v38  ;;  %v3487_v36 = vld [vmem:[#allocation56_spill] sm:$0xff] }
 0x304   : > { %v1211_v46 = vmul.f32 %v1195_v43, %v3051_v27  ;;  %v1020_v0 = vsel %vm3099_vm11, %v3445_v56, %v1016_v61  ;;  %v3474_v4 = vand.u32 2147483647, %v3444_v2  ;;  %v1381_v14 = vsub.f32 1.0, %v1365_v10  ;;  %v3485_v43 = vld [vmem:[#allocation24_spill] sm:$0xff]  ;;  %v3486_v10 = vld [vmem:[#allocation31_spill] sm:$0xff] }
 0x305   : > { %v1279_v57 = vmul.f32 %v1263_v26, %v2993_v18  ;;  %v1213_v40 = vmul.f32 %v1197_v5, %v3062_v62  ;;  %v1190_v44 = vmul.f32 %v1174_v55, %v3093_v17  ;;  %v1265_v2 = vadd.f32 0.2548296, %v1249_v7  ;;  %v3480_v18 = vld [vmem:[#allocation49_spill] sm:$0xff]  ;;  %v455_v61 = vld [vmem:[%s3166_s15 + $0x8] sm:$0xff]  ;;  %v3180_v55 = vld [vmem:[%s3305_s6] sm:$0xff] }
 0x306   : > { %vm1022_vm0 = vcmp.eq.f32.partialorder %v3474_v4, 8.507059e+37  ;;  %v1227_v56 = vadd.f32 -0.28449672, %v1211_v46  ;;  %v956_v41 = vadd.f32 %v3458_v60, %v3478_v13  ;;  %vm1393_vm12 = vcmp.lt.f32.partialorder %v3479_v11, 0.0  ;;  %1622 = vmatpush.msra.mxu1 %v455_v61  ;;  %v3489_v4 = vld [vmem:[#allocation34_spill] sm:$0xff]  ;;  %v3490_v13 = vld [vmem:[#allocation43_spill] sm:$0xff] }
 0x307   : > { %v3139_v16 = vsel %vm1022_vm0, %v3477_v33, %v1020_v0  ;;  %v1413_v58 = vsub.f32 0.0, %v1381_v14  ;;  %v1359_v12 = vmul.f32 %v3480_v18, %v1279_v57  ;;  %v1229_v50 = vadd.f32 -0.28449672, %v1213_v40  ;;  %1831 = vmatmul.msk.f32.vlgmr.msra.gmra.mxu1 %vm698_vm5, %v3180_v55  ;;  %v3491_v11 = vld [vmem:[#allocation42_spill] sm:$0xff] }
 0x308   : > { %v1206_v49 = vadd.f32 1.4214138, %v1190_v44  ;;  %v1281_v24 = vmul.f32 %v1265_v2, %v3012_v38  ;;  %v1243_v32 = vmul.f32 %v1227_v56, %v3051_v27  ;;  %v1154_v51 = vmul.f32 1.0614054, %v3139_v16 }
 0x309   : > { %v960_v48 = vsel %vm3126_vm2, %v3458_v60, %v956_v41  ;;  %v1429_v63 = vsel %vm1397_vm3, %v1413_v58, %v1381_v14  ;;  %v1375_v54 = vsub.f32 1.0, %v1359_v12  ;;  %v1245_v6 = vmul.f32 %v1229_v50, %v3062_v62 }
 0x30a   : > { %v1222_v20 = vmul.f32 %v1206_v49, %v3093_v17  ;;  %v1445_v47 = vadd.f32 1.0, %v1429_v63  ;;  %v1361_v38 = vmul.f32 %v3481_v3, %v1281_v24  ;;  %v1259_v28 = vadd.f32 0.2548296, %v1243_v32  ;;  %v3492_v49 = vld [vmem:[#allocation58_spill] sm:$0xff] }
 0x30b   : > { %v1170_v29 = vadd.f32 -1.4531521, %v1154_v51  ;;  %vm1387_vm1 = vcmp.lt.f32.partialorder %v3482_v42, 0.0  ;;  %v1407_v8 = vsub.f32 0.0, %v1375_v54  ;;  %v1261_v52 = vadd.f32 0.2548296, %v1245_v6 }
 0x30c   : > { %v1238_v59 = vadd.f32 -0.28449672, %v1222_v20  ;;  %v3483_v60 = vand.u32 2147483647, %v3457_v53  ;;  %v1461_v19 = vmul.f32 %v1445_v47, %v3484_v25  ;;  %v1377_v30 = vsub.f32 1.0, %v1361_v38  ;;  %v3493_v51 = vld [vmem:[#allocation23_spill] sm:$0xff] }
 0x30d   : > { %v1275_v1 = vmul.f32 %v1259_v28, %v3051_v27  ;;  %v1186_v9 = vmul.f32 %v1170_v29, %v3139_v16  ;;  %v1423_v21 = vsel %vm1391_vm14, %v1407_v8, %v1375_v54  ;;  %v1277_v45 = vmul.f32 %v1261_v52, %v3062_v62  ;;  %v3488_v62 = vld [vmem:[#allocation38_spill] sm:$0xff]  ;;  %v3495_v20 = vld [vmem:[#allocation13_spill] sm:$0xff]  ;;  %v3208_v29 = vld [vmem:[%s3305_s6 + $0x8] sm:$0xff] }
 0x30e   : > { %vm962_vm4 = vcmp.eq.f32.partialorder %v3483_v60, 8.507059e+37  ;;  %v1254_v53 = vmul.f32 %v1238_v59, %v3093_v17  ;;  %1543 = vmatpush.msrb.mxu2 %v1461_v19  ;;  %v1439_v27 = vadd.f32 1.0, %v1423_v21  ;;  %v1409_v37 = vsub.f32 0.0, %v1377_v30  ;;  %v3496_v42 = vld [vmem:[#allocation22_spill] sm:$0xff]  ;;  %v3497_v25 = vld [vmem:[#allocation37_spill] sm:$0xff]  ;;  %v3498_v19 = vld [vmem:[#allocation48_spill] sm:$0xff] }
 0x30f   : > { %v3173_v22 = vsel %vm962_vm4, %v3485_v43, %v960_v48  ;;  %v1355_v26 = vmul.f32 %v3486_v10, %v1275_v1  ;;  %v1202_v5 = vadd.f32 1.4214138, %v1186_v9  ;;  %vm1402_vm6 = vcmp.lt.f32.partialorder %v3487_v36, 0.0  ;;  %v3494_v48 = vld [vmem:[#allocation15_spill] sm:$0xff]  ;;  %1832 = vmatmul.msk.f32.gmra.mxu1 %vm698_vm5, %v3208_v29  ;;  %v3499_v43 = vld [vmem:[#allocation32_spill] sm:$0xff] }
 0x310   : > { %v1357_v7 = vmul.f32 %v3488_v62, %v1277_v45  ;;  %v1270_v46 = vadd.f32 0.2548296, %v1254_v53  ;;  %v1150_v0 = vmul.f32 1.0614054, %v3173_v22  ;;  %v1455_v35 = vmul.f32 %v1439_v27, %v3489_v4  ;;  %v454_v53 = vld [vmem:[%s3166_s15] sm:$0xff] }
 0x311   : > { %v1425_v14 = vsel %vm1393_vm12, %v1409_v37, %v1377_v30  ;;  %v1371_v57 = vsub.f32 1.0, %v1355_v26  ;;  %v1218_v40 = vmul.f32 %v1202_v5, %v3139_v16  ;;  %1970 = vpow2.f32 %v3490_v13  ;;  %v456_v26 = vld [vmem:[%s3166_s15 + $0x10] sm:$0xff]  ;;  %v3502_v13 = vld [vmem:[#allocation12_spill] sm:$0xff] }
 0x312   : > { %v1441_v44 = vadd.f32 1.0, %v1425_v14  ;;  %v1373_v2 = vsub.f32 1.0, %v1357_v7  ;;  %v1286_v56 = vmul.f32 %v1270_v46, %v3093_v17  ;;  %v1166_v33 = vadd.f32 -1.4531521, %v1150_v0  ;;  %1498 = vmatpush.msrb.mxu0 %v1455_v35  ;;  %1846 = vmatpush.msrb.mxu3 %v1455_v35  ;;  %v3500_v0 = vld [vmem:[#allocation18_spill] sm:$0xff]  ;;  %v3501_v14 = vld [vmem:[#allocation17_spill] sm:$0xff] }
 0x313   : > { %v1434_v41 = vsel %vm1402_vm6, %v2947_v31, %v1386_v34  ;;  %v1403_v58 = vsub.f32 0.0, %v1371_v57  ;;  %v1234_v18 = vadd.f32 -0.28449672, %v1218_v40  ;;  %v1329_v17 = vmul.f32 1.442695, %v3493_v51  ;;  %v1475_v51 = vpop.permute.xlu1 %1474 }
 0x314   : > { %v1457_v12 = vmul.f32 %v1441_v44, %v3491_v11  ;;  %v1405_v50 = vsub.f32 0.0, %v1373_v2  ;;  %v1366_v24 = vmul.f32 %v3492_v49, %v1286_v56  ;;  %v1182_v32 = vmul.f32 %v1166_v33, %v3173_v22 }
 0x315   : > { %vm1389_vm9 = vcmp.lt.f32.partialorder %v3494_v48, 0.0  ;;  %v1419_v23 = vsel %vm1387_vm1, %v1403_v58, %v1371_v57  ;;  %v1250_v34 = vmul.f32 %v1234_v18, %v3139_v16  ;;  %v829_v47 = vmul.f32 0.5, %v3495_v20  ;;  %v3503_v58 = vld [vmem:[#allocation11_spill] sm:$0xff] }
 0x316   : > { %1544 = vmatpush.msrb.mxu2 %v1457_v12  ;;  %v1435_v31 = vadd.f32 1.0, %v1419_v23  ;;  %v1421_v63 = vsel %vm1389_vm9, %v1405_v50, %v1373_v2  ;;  %v1382_v54 = vsub.f32 1.0, %v1366_v24  ;;  %v1198_v6 = vadd.f32 1.4214138, %v1182_v32  ;;  %v457_v50 = vld [vmem:[%s3166_s15 + $0x18] sm:$0xff]  ;;  %s1693_s15 = scalar_lea.sflag [#allocation4], %s2199_s23 }
 0x317   : > { %v1450_v3 = vadd.f32 1.0, %v1434_v41  ;;  %v1437_v38 = vadd.f32 1.0, %v1421_v63  ;;  %v1266_v28 = vadd.f32 0.2548296, %v1250_v34  ;;  %v1971_v60 = vpop.eup %1970  ;;  %vm1398_vm13 = vcmp.lt.f32.partialorder %v3497_v25, 0.0 }
 0x318   : > { %v1451_v8 = vmul.f32 %v1435_v31, %v3496_v42  ;;  %v1414_v52 = vsub.f32 0.0, %v1382_v54  ;;  %v1214_v59 = vmul.f32 %v1198_v6, %v3173_v22  ;;  %v842_v30 = vmul.f32 0.5, %v3498_v19 }
 0x319   : > { %v1453_v1 = vmul.f32 %v1437_v38, %v829_v47  ;;  %v1282_v9 = vmul.f32 %v1266_v28, %v3139_v16  ;;  %1972 = vpow2.f32 %v1329_v17  ;;  %v838_v61 = vmul.f32 0.5, %v3499_v43 }
 0x31a   : > { %1499 = vmatpush.msrb.mxu0 %v1451_v8  ;;  %1847 = vmatpush.msrb.mxu3 %v1451_v8  ;;  %v1430_v21 = vsel %vm1398_vm13, %v1414_v52, %v1382_v54  ;;  %v1230_v45 = vadd.f32 -0.28449672, %v1214_v59  ;;  %v1466_v27 = vmul.f32 %v1450_v3, %v842_v30  ;;  %vm1394_vm7 = vcmp.lt.f32.partialorder %v3500_v0, 0.0 }
 0x31b   : > { %1545 = vmatpush.msrb.mxu2 %v1453_v1  ;;  %1821 = vmatmul.msk.f32.vlgmr.msrb.gmra.mxu0 %vm1477_vm8, %v3009_v39  ;;  %v1446_v37 = vadd.f32 1.0, %v1430_v21  ;;  %v1362_v10 = vmul.f32 %v1971_v60, %v1282_v9  ;;  %v834_v57 = vmul.f32 0.5, %v3501_v14  ;;  %vm1390_vm15 = vcmp.lt.f32.partialorder %v3502_v13, 0.0 }
 0x31c   : > { %1822 = vmatmul.msk.f32.vlgmr.msrb.gmra.mxu3 %vm1477_vm8, %v3090_v15  ;;  %1825 = vmatmul.msk.f32.vlgmr.msrb.gmra.mxu2 %vm1477_vm8, %v3009_v39  ;;  %v1246_v16 = vmul.f32 %v1230_v45, %v3173_v22  ;;  %v830_v18 = vmul.f32 0.5, %v3503_v58 }
 0x31d   : > { %1565 = vmatpush.msra.mxu3 %v1466_v27  ;;  %v1462_v5 = vmul.f32 %v1446_v37, %v838_v61  ;;  %v1378_v36 = vsub.f32 1.0, %v1362_v10  ;;  %1599 = vmatpush.msra.mxu0 %v454_v53 }
 0x31e   : > { %v1262_v62 = vadd.f32 0.2548296, %v1246_v16  ;;  %1645 = vmatpush.msra.mxu2 %v456_v26 }
 0x31f   : > { %1566 = vmatpush.msra.mxu3 %v1462_v5  ;;  %v1410_v7 = vsub.f32 0.0, %v1378_v36  ;;  %v1973_v46 = vpop.eup %1972 }
 0x320   : > { %v1278_v4 = vmul.f32 %v1262_v62, %v3173_v22  ;;  %v470_v22 = vld [vmem:[%s3306_s7] sm:$0xff] }
 0x321   : > { %v1426_v35 = vsel %vm1394_vm7, %v1410_v7, %v1378_v36  ;;  %1469 = vperm.xlu0 %1905, %v470_v22  }
 0x322   : > { %v1442_v40 = vadd.f32 1.0, %v1426_v35  ;;  %v1358_v44 = vmul.f32 %v1973_v46, %v1278_v4 }
 0x323   : > { %1829 = vmatmul.msk.f32.vlgmr.msra.gmra.mxu0 %vm698_vm5, %v3180_v55 }
 0x324   : > { %v1458_v2 = vmul.f32 %v1442_v40, %v834_v57  ;;  %v1374_v56 = vsub.f32 1.0, %v1358_v44  ;;  %1826 = vmatmul.msk.f32.gmra.mxu2 %vm1477_vm8, %v3090_v15 }
 0x326   : > { %1567 = vmatpush.msra.mxu3 %v1458_v2  ;;  %v1406_v33 = vsub.f32 0.0, %v1374_v56 }
 0x328   : > { %v1422_v41 = vsel %vm1390_vm15, %v1406_v33, %v1374_v56 }
 0x329   : > { %v1438_v11 = vadd.f32 1.0, %v1422_v41 }
 0x32b   : > { %v1454_v12 = vmul.f32 %v1438_v11, %v830_v18  ;;  %1830 = vmatmul.msk.f32.gmra.mxu0 %vm698_vm5, %v3208_v29 }
 0x32c   : > { %1833 = vmatmul.msk.f32.vlgmr.msra.gmra.mxu2 %vm698_vm5, %v3180_v55 }
 0x32d   : > { %1568 = vmatpush.msra.mxu3 %v1454_v12 }
 0x32e   : > { %1827 = vmatmul.msk.f32.vlgmr.msra.gmra.mxu3 %vm1477_vm8, %v3009_v39 }
 0x32f   : > { %1668 = vmatpush.msrb.mxu3 %v457_v50 }
 0x334   : > { %1834 = vmatmul.msk.f32.gmra.mxu2 %vm698_vm5, %v3208_v29 }
 0x336   : > { %1828 = vmatmul.msk.f32.gmra.mxu3 %vm1477_vm8, %v3090_v15 }
 0x33e   : > { %1835 = vmatmul.msk.f32.vlgmr.msrb.gmra.mxu3 %vm698_vm5, %v3180_v55 }
 0x346   : > { %1836 = vmatmul.msk.f32.gmra.mxu3 %vm698_vm5, %v3208_v29 }
 0x374   : > { %v1524_v49 = vpop.f32.mrf.mxu1 }
 0x37c   : > { %v1527_v24 = vpop.f32.mrf.mxu1 }
 0x37d   : > { %v1528_v17 = vadd.f32 %v1527_v24, %v1475_v51 }
 0x384   : > { %v1624_v32 = vpop.f32.mrf.mxu1 }
 0x38c   : > { %v1627_v39 = vpop.f32.mrf.mxu1 }
 0x38d   : > { %v1681_v48 = vadd.f32 %v1627_v39, %v1528_v17 }
 0x38f   : > { %1689 = vst [vmem:[%s3255_s21 + $0x28] sm:$0xff] %v1681_v48 }
 0x393   : > { %v1470_v20 = vpop.permute.xlu0 %1469 }
 0x394   : > { %v1525_v3 = vadd.f32 %v1524_v49, %v1470_v20 }
 0x396   : > { %v1677_v42 = vadd.f32 %v1624_v32, %v1525_v3 }
 0x398   : > { %v1501_v23 = vpop.f32.mrf.mxu0  ;;  %1685 = vst [vmem:[%s3255_s21 + $0x8] sm:$0xff] %v1677_v42 }
 0x399   : > { %v1502_v47 = vadd.f32 %v1501_v23, %v1470_v20 }
 0x39f   : > { %v1547_v15 = vpop.f32.mrf.mxu2  ;;  %v1504_v55 = vpop.f32.mrf.mxu3 }
 0x3a0   : > { %v1601_v34 = vpop.f32.mrf.mxu0  ;;  %v1505_v31 = vadd.f32 %v1504_v55, %v1475_v51  ;;  %v1548_v38 = vadd.f32 %v1547_v15, %v1470_v20 }
 0x3a1   : > { %v1676_v29 = vadd.f32 %v1601_v34, %v1502_v47 }
 0x3a3   : > { %1684 = vst [vmem:[%s3255_s21] sm:$0xff] %v1676_v29 }
 0x3a7   : > { %v1550_v63 = vpop.f32.mrf.mxu2 }
 0x3a8   : > { %v1604_v54 = vpop.f32.mrf.mxu0  ;;  %v1551_v59 = vadd.f32 %v1550_v63, %v1475_v51 }
 0x3a9   : > { %v1680_v6 = vadd.f32 %v1604_v54, %v1505_v31 }
 0x3ab   : > { %1688 = vst [vmem:[%s3255_s21 + $0x20] sm:$0xff] %v1680_v6 }
 0x3af   : > { %v1647_v28 = vpop.f32.mrf.mxu2 }
 0x3b0   : > { %v1678_v8 = vadd.f32 %v1647_v28, %v1548_v38 }
 0x3b1   : > { %v1570_v52 = vpop.f32.mrf.mxu3 }
 0x3b2   : > { %1686 = vst [vmem:[%s3255_s21 + $0x10] sm:$0xff] %v1678_v8  ;;  %v1571_v30 = vadd.f32 %v1570_v52, %v1470_v20 }
 0x3b7   : > { %v1650_v60 = vpop.f32.mrf.mxu2 }
 0x3b8   : > { %v1682_v25 = vadd.f32 %v1650_v60, %v1551_v59 }
 0x3b9   : > { %v1573_v19 = vpop.f32.mrf.mxu3 }
 0x3ba   : > { %1690 = vst [vmem:[%s3255_s21 + $0x30] sm:$0xff] %v1682_v25  ;;  %v1574_v21 = vadd.f32 %v1573_v19, %v1475_v51 }
 0x3c1   : > { %v1670_v1 = vpop.f32.mrf.mxu3 }
 0x3c2   : > { %v1679_v9 = vadd.f32 %v1670_v1, %v1571_v30 }
 0x3c4   : > { %1687 = vst [vmem:[%s3255_s21 + $0x18] sm:$0xff] %v1679_v9 }
 0x3c9   : > { %v1673_v45 = vpop.f32.mrf.mxu3 }
 0x3ca   : > { %v1683_v53 = vadd.f32 %v1673_v45, %v1574_v21 }
 0x3cc   : > { %1691 = vst [vmem:[%s3255_s21 + $0x38] sm:$0xff] %v1683_v53 }
 0x3cd   : > { %2031 = shalt.err (!%p2028_p8)
}
 0x3ce   : > { %s2076_s23 = smov 512   ;;  %s2077_s19 = smov 32  }
 0x3cf   : > { %1853 = dma.vmem_to_hbm [thread:$0]  (%p2169_p11), %s1706_s11, 1024, %s1708_s14, %s1693_s15, %s2076_s23, %s2076_s23, %s2077_s19  }
 0x3d0 PF: > { %s1722_s21 = sand.u32 1, %s2058_s27   ;;  %p1860_p10 = pnand %p1795_p9, %p2173_p12 }
 0x3d1   : > { %s1723_s22 = scalar_lea.sflag [#allocation4], %s1722_s21 }
 0x3d2   : > { %p1861_p0 = pneg %p1860_p10 }
 0x3d4   : > { %2053 = dma.done.wait (%p1861_p0), %s1723_s22, 1024  }
 0x3d5   : > { %2055 = vsyncadd (%p1861_p0), %s1723_s22, 4294966272  ;;  %s3504_s30 = sld [smem:[#allocation9_spill]]  ;;  %s3507_s27 = smov %s2062_s28 }
 0x3d6   : > { %s3505_s18 = sld [smem:[#allocation8_spill]] }
 0x3d7   : > { %s3506_s29 = sld [smem:[#allocation10_spill]] }
 0x3db   : > { %p21_p1 = scmp.ge.s32.totalorder %s3504_s30, 4  }
 0x3dc   : > { %s3508_s28 = smov %s3505_s18 }
 0x3dd   :  { %23 = sbr.rel (!%p21_p1) target bundleno = 5 (0x5), region = 100 }
 0x3e2   :  { %1729 = vsyncpa [#allocation3], 1 }
 0x3e3   :  { %1731 = vsyncpa [#allocation3 + $0x1], 1 }
 0x3e4   :  { %1732 = vsyncpa [#allocation4], 1 }
 0x3e5   :  { %1734 = vsyncpa [#allocation4 + $0x1], 1 }

</bundles_post_ra>
